<compile_context>
chip_gen: v7x
topology: tpu7x:2x2x1
jax: 0.10.0
libtpu: 0.0.40
codegen_flags: <defaults>
</compile_context>

<pallas_src>
import functools

import jax
import jax.numpy as jnp
from jax.experimental import pallas as pl
from jax.experimental.pallas import tpu as pltpu


def _round_up(x, m):
    return ((x + m - 1) // m) * m


def _ppnet_mlp_kernel(n_hidden, hidden_dims, pad_h0, sum_ghid, gcol_offsets,
                      fe_ref, ge_ref, few_ref, gew_ref, fb_ref,
                      gw2bd_ref, gb2p_ref, *refs):
    """refs layout: (W_i, b_i) for i in 1..n_hidden-1, then (W_out, b_out),
    then out_ref (last).  Matmul operands stay in their stored dtype (bf16
    capable); accumulation and elementwise math are f32."""
    out_ref = refs[-1]
    layer_refs = refs[:-3]
    w_out_ref, b_out_ref = refs[-3], refs[-2]

    fe = fe_ref[...]
    ge = ge_ref[...]

    # Fused wide matmul: [ fe@W0_pad | fe@gw1_fe_all ] + [ 0 | ge@gw1_ge_all ]
    # + [ b0_pad | gb1_all ].  ReLU applies both to the first MLP layer and to
    # the GateNU hidden activations (both use ReLU).
    big = (jnp.dot(fe, few_ref[...], preferred_element_type=jnp.float32)
           + jnp.dot(ge, gew_ref[...], preferred_element_type=jnp.float32)
           + fb_ref[...])
    big = jnp.maximum(big, 0.0)

    h0_dim = hidden_dims[0]
    h = big[:, :h0_dim]                                  # ReLU(fe @ W0 + b0)
    gh_all = big[:, pad_h0:pad_h0 + sum_ghid]            # 128-aligned start

    # All GateNU second layers as one block-diagonal matmul; each layer's gate
    # block padded to a 128-lane boundary so later slices are lane-aligned.
    gw2bd = gw2bd_ref[...]
    z = jnp.dot(gh_all.astype(gw2bd.dtype), gw2bd,
                preferred_element_type=jnp.float32) + gb2p_ref[...]
    g_all = 1.0 + jnp.tanh(0.5 * z)                      # == 2*sigmoid(z)

    h = h * g_all[:, gcol_offsets[0]:gcol_offsets[0] + h0_dim]

    for i in range(1, n_hidden):
        w_ref, b_ref = layer_refs[2 * (i - 1)], layer_refs[2 * (i - 1) + 1]
        w = w_ref[...]
        h = jnp.dot(h.astype(w.dtype), w,
                    preferred_element_type=jnp.float32) + b_ref[...]
        h = jnp.maximum(h, 0.0)
        h = h * g_all[:, gcol_offsets[i]:gcol_offsets[i] + hidden_dims[i]]

    w_out = w_out_ref[...]
    b_out = b_out_ref[...]
    out_dim = out_ref.shape[-1]
    if out_dim == 1:
        # N=1 MXU pass wastes the array width; use VPU mul + lane reduce.
        out = jnp.sum(h * w_out.reshape(1, -1).astype(jnp.float32),
                      axis=-1, keepdims=True) + b_out.astype(jnp.float32)
    else:
        out = jnp.dot(h.astype(w_out.dtype), w_out,
                      preferred_element_type=jnp.float32) + b_out
    out_ref[...] = out.astype(out_ref.dtype)


def _tensorcores_per_chip():
    """Best-effort detection: v7x (and v4 megacore) have 2 TCs per device."""
    try:
        kind = jax.devices()[0].device_kind.lower()
    except Exception:
        return 1
    return 2 if ("v7" in kind or "v4" in kind) else 1


def _pick_block_b(B, dtype, max_block_b=2048):
    """Largest divisor of B that is a multiple of the sublane-packing unit and
    <= max_block_b.  Only on multi-TensorCore chips do we force >=2 grid steps
    (the grid is a serial loop on single-TC v5e/v6e)."""
    mult = 16 if dtype == jnp.bfloat16 else 8
    if _tensorcores_per_chip() >= 2:
        target = min(max_block_b, max(B // 2, mult))
    else:
        target = min(max_block_b, B)
    for cand in range(target, 0, -1):
        if B % cand == 0 and cand % mult == 0:
            return cand
    return B  # single full-array tile (legal: block equals full array dim)


def ppnet_mlp_forward(feature_emb, gate_emb, params, *, block_b=None,
                      max_block_b=2048):
    """Pallas wrapper.

    `params` is the flat per-layer list (same layout as make_ppnet_params):
      per hidden layer: (W, b, gW1, gb1, gW2, gb2); then (W_out, b_out).
    All weight packing / padding for the fused matmuls happens here on host.
    """
    B, input_dim = feature_emb.shape
    gate_emb_dim = gate_emb.shape[-1]
    n_hidden = (len(params) - 2) // 6
    assert n_hidden >= 1, "expect at least one hidden layer"
    out_dim = params[-1].shape[-1]
    act_dtype = feature_emb.dtype
    p_dtype = params[0].dtype

    if block_b is None:
        block_b = _pick_block_b(B, act_dtype, max_block_b)
    assert B % block_b == 0

    hidden_dims = tuple(params[6 * i].shape[1] for i in range(n_hidden))
    ghid_dims = tuple(params[6 * i + 2].shape[1] for i in range(n_hidden))
    sum_ghid = sum(ghid_dims)
    pad_h0 = _round_up(hidden_dims[0], 128)

    # ---- fused fe/ge first matmul: [W0_pad | gw1_fe...], [0 | gw1_ge...] ----
    w0, b0 = params[0], params[1]
    fe_w_parts = [jnp.pad(w0, ((0, 0), (0, pad_h0 - hidden_dims[0])))]
    ge_w_parts = [jnp.zeros((gate_emb_dim, pad_h0), dtype=p_dtype)]
    fb_parts = [jnp.pad(b0, ((0, 0), (0, pad_h0 - hidden_dims[0])))]
    for i in range(n_hidden):
        gw1, gb1 = params[6 * i + 2], params[6 * i + 3]
        assert gw1.shape[0] == input_dim + gate_emb_dim, \
            "gate_input_dim must equal feature_dim + gate_emb_dim"
        fe_w_parts.append(gw1[:input_dim, :])
        ge_w_parts.append(gw1[input_dim:, :])
        fb_parts.append(gb1)
    fe_w = jnp.concatenate(fe_w_parts, axis=1)
    ge_w = jnp.concatenate(ge_w_parts, axis=1)
    fb = jnp.concatenate(fb_parts, axis=1)

    # ---- block-diagonal gw2 (each layer's gate block padded to 128 lanes) ----
    gcols = tuple(_round_up(d, 128) for d in hidden_dims)
    total_gcol = sum(gcols)
    gw2_bd = jnp.zeros((sum_ghid, total_gcol), dtype=p_dtype)
    gb2_p = jnp.zeros((1, total_gcol), dtype=p_dtype)
    gcol_offsets = []
    roff = coff = 0
    for i in range(n_hidden):
        gw2, gb2 = params[6 * i + 4], params[6 * i + 5]
        gw2_bd = gw2_bd.at[roff:roff + ghid_dims[i],
                           coff:coff + hidden_dims[i]].set(gw2)
        gb2_p = gb2_p.at[:, coff:coff + hidden_dims[i]].set(gb2)
        gcol_offsets.append(coff)
        roff += ghid_dims[i]
        coff += gcols[i]
    gcol_offsets = tuple(gcol_offsets)

    # Remaining per-layer weights (layers 1..n-1) + output projection.
    extra_params = []
    for i in range(1, n_hidden):
        extra_params += [params[6 * i], params[6 * i + 1]]
    extra_params += [params[-2], params[-1]]

    def batch_spec(d):
        # tile over batch only; feature axis (lane axis) kept full
        return pl.BlockSpec((block_b, d), lambda i: (i, 0))

    def full_spec(shape):
        # constant block index => Pallas loads each parameter once and keeps it
        # resident in VMEM across all grid steps (no per-step param DMA).
        return pl.BlockSpec(shape, lambda i: (0,) * len(shape))

    weight_inputs = [fe_w, ge_w, fb, gw2_bd, gb2_p] + extra_params
    in_specs = [batch_spec(input_dim), batch_spec(gate_emb_dim)]
    in_specs += [full_spec(p.shape) for p in weight_inputs]
    out_spec = batch_spec(out_dim)

    kernel = functools.partial(_ppnet_mlp_kernel, n_hidden, hidden_dims,
                               pad_h0, sum_ghid, gcol_offsets)
    return pl.pallas_call(
        kernel,
        grid=(B // block_b,),
        in_specs=in_specs,
        out_specs=out_spec,
        out_shape=jax.ShapeDtypeStruct((B, out_dim), act_dtype),
        compiler_params=pltpu.CompilerParams(dimension_semantics=("parallel",)),
    )(feature_emb, gate_emb, *weight_inputs)


# ---------------- parameter construction (deterministic, synthetic) ----------------

def _linear_params(key, fan_in, fan_out, dtype=jnp.float32):
    kw, kb = jax.random.split(key)
    scale = 1.0 / jnp.sqrt(fan_in)
    w = jax.random.uniform(kw, (fan_in, fan_out), jnp.float32, -scale, scale)
    b = jax.random.uniform(kb, (1, fan_out), jnp.float32, -scale, scale)
    return w.astype(dtype), b.astype(dtype)


def make_ppnet_params(key, input_dim, gate_input_dim, hidden_units, output_dim=1,
                      gate_hidden_dim=None, dtype=jnp.float32):
    params = []
    dims = [input_dim] + list(hidden_units)
    for idx in range(len(dims) - 1):
        key, k1, k2, k3 = jax.random.split(key, 4)
        # MLP layer
        w, b = _linear_params(k1, dims[idx], dims[idx + 1], dtype)
        # GateNU: gate_hidden_dim defaults to the layer's output_dim
        ghid = dims[idx + 1] if gate_hidden_dim is None else gate_hidden_dim
        gw1, gb1 = _linear_params(k2, gate_input_dim, ghid, dtype)
        gw2, gb2 = _linear_params(k3, ghid, dims[idx + 1], dtype)
        params += [w, b, gw1, gb1, gw2, gb2]
    key, kf = jax.random.split(key)
    w_out, b_out = _linear_params(kf, dims[-1], output_dim, dtype)
    params += [w_out, b_out]
    return params


# ---------------- pure-JAX reference for verification ----------------

def ppnet_mlp_ref(feature_emb, gate_emb, params):
    n_hidden = (len(params) - 2) // 6
    f32 = lambda x: x.astype(jnp.float32)
    gate_input = jnp.concatenate([f32(feature_emb), f32(gate_emb)], axis=-1)
    h = f32(feature_emb)
    for i in range(n_hidden):
        w, b, gw1, gb1, gw2, gb2 = [f32(p) for p in params[6 * i: 6 * i + 6]]
        h = jnp.maximum(h @ w + b, 0.0)
        g = jax.nn.sigmoid(jnp.maximum(gate_input @ gw1 + gb1, 0.0) @ gw2 + gb2) * 2.0
        h = h * g
    w_out, b_out = f32(params[-2]), f32(params[-1])
    return h @ w_out + b_out


if __name__ == "__main__":
    # Small shapes consistent with the module (realistic batch so the kernel
    # exercises its tiling logic; f32 demo for a tight correctness check --
    # the kernel itself never upcasts operands, so bf16 params/activations run
    # natively on the MXU).
    B = 256
    input_dim = 32          # feature_emb dim
    gate_emb_dim = 32       # gate_emb dim
    gate_input_dim = input_dim + gate_emb_dim   # cat([fe, ge], -1)
    hidden_units = [64, 32]
    output_dim = 1

    key = jax.random.PRNGKey(0)
    k_fe, k_ge, k_params = jax.random.split(key, 3)
    feature_emb = jax.random.normal(k_fe, (B, input_dim), jnp.float32)
    gate_emb = jax.random.normal(k_ge, (B, gate_emb_dim), jnp.float32)
    params = make_ppnet_params(k_params, input_dim, gate_input_dim,
                               hidden_units, output_dim)

    out = ppnet_mlp_forward(feature_emb, gate_emb, params)
    out = jax.block_until_ready(out)

    ref = ppnet_mlp_ref(feature_emb, gate_emb, params)
    assert out.shape == (B, output_dim)
    assert jnp.allclose(out, ref, atol=5e-4, rtol=5e-4), "mismatch vs reference"

    print("KERNEL_OK")
</pallas_src>

<mosaic_0001>
module attributes {stable_mosaic.version = 11 : i64} {
  func.func @_ppnet_mlp_kernel(%arg0: i32, %arg1: memref<256x32xf32, #tpu.memory_space<vmem>>, %arg2: memref<256x32xf32, #tpu.memory_space<vmem>>, %arg3: memref<32x224xf32, #tpu.memory_space<vmem>>, %arg4: memref<32x224xf32, #tpu.memory_space<vmem>>, %arg5: memref<1x224xf32, #tpu.memory_space<vmem>>, %arg6: memref<96x256xf32, #tpu.memory_space<vmem>>, %arg7: memref<1x256xf32, #tpu.memory_space<vmem>>, %arg8: memref<64x32xf32, #tpu.memory_space<vmem>>, %arg9: memref<1x32xf32, #tpu.memory_space<vmem>>, %arg10: memref<32x1xf32, #tpu.memory_space<vmem>>, %arg11: memref<1x1xf32, #tpu.memory_space<vmem>>, %arg12: memref<256x1xf32, #tpu.memory_space<vmem>>) attributes {dimension_semantics = [#tpu.dimension_semantics<parallel>], iteration_bounds = array<i64: 1>, scalar_prefetch = 0 : i64, scratch_operands = 0 : i64, tpu.core_type = #tpu.core_type<tc>, window_params = [{transform_indices = @transform_0, window_bounds = array<i64: 256, 32>}, {transform_indices = @transform_1, window_bounds = array<i64: 256, 32>}, {pipeline_mode = #tpu.pipeline_mode<synchronous>, transform_indices = @transform_2, window_bounds = array<i64: 32, 224>}, {pipeline_mode = #tpu.pipeline_mode<synchronous>, transform_indices = @transform_3, window_bounds = array<i64: 32, 224>}, {pipeline_mode = #tpu.pipeline_mode<synchronous>, transform_indices = @transform_4, window_bounds = array<i64: 1, 224>}, {pipeline_mode = #tpu.pipeline_mode<synchronous>, transform_indices = @transform_5, window_bounds = array<i64: 96, 256>}, {pipeline_mode = #tpu.pipeline_mode<synchronous>, transform_indices = @transform_6, window_bounds = array<i64: 1, 256>}, {pipeline_mode = #tpu.pipeline_mode<synchronous>, transform_indices = @transform_7, window_bounds = array<i64: 64, 32>}, {pipeline_mode = #tpu.pipeline_mode<synchronous>, transform_indices = @transform_8, window_bounds = array<i64: 1, 32>}, {pipeline_mode = #tpu.pipeline_mode<synchronous>, transform_indices = @transform_9, window_bounds = array<i64: 32, 1>}, {pipeline_mode = #tpu.pipeline_mode<synchronous>, transform_indices = @transform_10, window_bounds = array<i64: 1, 1>}, {transform_indices = @transform_11, window_bounds = array<i64: 256, 1>}]} {
    %c0 = arith.constant 0 : index
    %c0_0 = arith.constant 0 : index
    %0 = vector.load %arg1[%c0, %c0_0] : memref<256x32xf32, #tpu.memory_space<vmem>>, vector<256x32xf32>
    %c0_1 = arith.constant 0 : index
    %c0_2 = arith.constant 0 : index
    %1 = vector.load %arg2[%c0_1, %c0_2] : memref<256x32xf32, #tpu.memory_space<vmem>>, vector<256x32xf32>
    %c0_3 = arith.constant 0 : index
    %c0_4 = arith.constant 0 : index
    %2 = vector.load %arg3[%c0_3, %c0_4] : memref<32x224xf32, #tpu.memory_space<vmem>>, vector<32x224xf32>
    %cst = arith.constant dense<0.000000e+00> : vector<256x224xf32>
    %3 = tpu.matmul %0, %2, %cst {dimension_numbers = #tpu.dot_dimension_numbers<[1], [0], [0], [1], [0, 0, 1, 1], [], []>} : vector<256x32xf32>, vector<32x224xf32>, vector<256x224xf32> -> vector<256x224xf32>
    %c0_5 = arith.constant 0 : index
    %c0_6 = arith.constant 0 : index
    %4 = vector.load %arg4[%c0_5, %c0_6] : memref<32x224xf32, #tpu.memory_space<vmem>>, vector<32x224xf32>
    %cst_7 = arith.constant dense<0.000000e+00> : vector<256x224xf32>
    %5 = tpu.matmul %1, %4, %cst_7 {dimension_numbers = #tpu.dot_dimension_numbers<[1], [0], [0], [1], [0, 0, 1, 1], [], []>} : vector<256x32xf32>, vector<32x224xf32>, vector<256x224xf32> -> vector<256x224xf32>
    %6 = arith.addf %3, %5 : vector<256x224xf32>
    %c0_8 = arith.constant 0 : index
    %c0_9 = arith.constant 0 : index
    %7 = vector.load %arg5[%c0_8, %c0_9] : memref<1x224xf32, #tpu.memory_space<vmem>>, vector<1x224xf32>
    %8 = vector.broadcast %7 : vector<1x224xf32> to vector<256x224xf32>
    %9 = arith.addf %6, %8 : vector<256x224xf32>
    %cst_10 = arith.constant 0.000000e+00 : f32
    %10 = vector.broadcast %cst_10 : f32 to vector<256x224xf32>
    %11 = arith.maximumf %9, %10 : vector<256x224xf32>
    %12 = vector.extract_strided_slice %11 {offsets = [0, 0], sizes = [256, 64], strides = [1, 1]} : vector<256x224xf32> to vector<256x64xf32>
    %13 = vector.extract_strided_slice %11 {offsets = [0, 128], sizes = [256, 96], strides = [1, 1]} : vector<256x224xf32> to vector<256x96xf32>
    %c0_11 = arith.constant 0 : index
    %c0_12 = arith.constant 0 : index
    %14 = vector.load %arg6[%c0_11, %c0_12] : memref<96x256xf32, #tpu.memory_space<vmem>>, vector<96x256xf32>
    %cst_13 = arith.constant dense<0.000000e+00> : vector<256x256xf32>
    %15 = tpu.matmul %13, %14, %cst_13 {dimension_numbers = #tpu.dot_dimension_numbers<[1], [0], [0], [1], [0, 0, 1, 1], [], []>} : vector<256x96xf32>, vector<96x256xf32>, vector<256x256xf32> -> vector<256x256xf32>
    %c0_14 = arith.constant 0 : index
    %c0_15 = arith.constant 0 : index
    %16 = vector.load %arg7[%c0_14, %c0_15] : memref<1x256xf32, #tpu.memory_space<vmem>>, vector<1x256xf32>
    %17 = vector.broadcast %16 : vector<1x256xf32> to vector<256x256xf32>
    %18 = arith.addf %15, %17 : vector<256x256xf32>
    %cst_16 = arith.constant 5.000000e-01 : f32
    %19 = vector.broadcast %cst_16 : f32 to vector<256x256xf32>
    %20 = arith.mulf %19, %18 : vector<256x256xf32>
    %21 = math.tanh %20 : vector<256x256xf32>
    %cst_17 = arith.constant 1.000000e+00 : f32
    %22 = vector.broadcast %cst_17 : f32 to vector<256x256xf32>
    %23 = arith.addf %22, %21 : vector<256x256xf32>
    %24 = vector.extract_strided_slice %23 {offsets = [0, 0], sizes = [256, 64], strides = [1, 1]} : vector<256x256xf32> to vector<256x64xf32>
    %25 = arith.mulf %12, %24 : vector<256x64xf32>
    %c0_18 = arith.constant 0 : index
    %c0_19 = arith.constant 0 : index
    %26 = vector.load %arg8[%c0_18, %c0_19] : memref<64x32xf32, #tpu.memory_space<vmem>>, vector<64x32xf32>
    %cst_20 = arith.constant dense<0.000000e+00> : vector<256x32xf32>
    %27 = tpu.matmul %25, %26, %cst_20 {dimension_numbers = #tpu.dot_dimension_numbers<[1], [0], [0], [1], [0, 0, 1, 1], [], []>} : vector<256x64xf32>, vector<64x32xf32>, vector<256x32xf32> -> vector<256x32xf32>
    %c0_21 = arith.constant 0 : index
    %c0_22 = arith.constant 0 : index
    %28 = vector.load %arg9[%c0_21, %c0_22] : memref<1x32xf32, #tpu.memory_space<vmem>>, vector<1x32xf32>
    %29 = vector.broadcast %28 : vector<1x32xf32> to vector<256x32xf32>
    %30 = arith.addf %27, %29 : vector<256x32xf32>
    %cst_23 = arith.constant 0.000000e+00 : f32
    %31 = vector.broadcast %cst_23 : f32 to vector<256x32xf32>
    %32 = arith.maximumf %30, %31 : vector<256x32xf32>
    %33 = vector.extract_strided_slice %23 {offsets = [0, 128], sizes = [256, 32], strides = [1, 1]} : vector<256x256xf32> to vector<256x32xf32>
    %34 = arith.mulf %32, %33 : vector<256x32xf32>
    %c0_24 = arith.constant 0 : index
    %c0_25 = arith.constant 0 : index
    %35 = vector.load %arg10[%c0_24, %c0_25] : memref<32x1xf32, #tpu.memory_space<vmem>>, vector<32x1xf32>
    %c0_26 = arith.constant 0 : index
    %c0_27 = arith.constant 0 : index
    %36 = vector.load %arg11[%c0_26, %c0_27] : memref<1x1xf32, #tpu.memory_space<vmem>>, vector<1x1xf32>
    %37 = vector.shape_cast %35 : vector<32x1xf32> to vector<1x32xf32>
    %38 = vector.broadcast %37 : vector<1x32xf32> to vector<256x32xf32>
    %39 = arith.mulf %34, %38 : vector<256x32xf32>
    %cst_28 = arith.constant dense<0.000000e+00> : vector<256xf32>
    %40 = vector.multi_reduction <add>, %39, %cst_28 [1] : vector<256x32xf32> to vector<256xf32>
    %41 = vector.shape_cast %40 : vector<256xf32> to vector<256x1xf32>
    %42 = vector.broadcast %36 : vector<1x1xf32> to vector<256x1xf32>
    %43 = arith.addf %41, %42 : vector<256x1xf32>
    %c0_29 = arith.constant 0 : index
    %c0_30 = arith.constant 0 : index
    %44 = vector.load %arg12[%c0_29, %c0_30] : memref<256x1xf32, #tpu.memory_space<vmem>>, vector<256x1xf32>
    tpu.vector_store %arg12[%c0_29, %c0_30], %43 {strides = array<i32>} : memref<256x1xf32, #tpu.memory_space<vmem>>, vector<256x1xf32>,
    return
  }
  func.func @transform_0(%arg0: i32) -> (i32, i32) {
    %c0_i32 = arith.constant 0 : i32
    %c0_i32_0 = arith.constant 0 : i32
    return %arg0, %c0_i32 : i32, i32
  }
  func.func @transform_1(%arg0: i32) -> (i32, i32) {
    %c0_i32 = arith.constant 0 : i32
    %c0_i32_0 = arith.constant 0 : i32
    return %arg0, %c0_i32 : i32, i32
  }
  func.func @transform_2(%arg0: i32) -> (i32, i32) {
    %c0_i32 = arith.constant 0 : i32
    %c0_i32_0 = arith.constant 0 : i32
    %c0_i32_1 = arith.constant 0 : i32
    return %c0_i32, %c0_i32_0 : i32, i32
  }
  func.func @transform_3(%arg0: i32) -> (i32, i32) {
    %c0_i32 = arith.constant 0 : i32
    %c0_i32_0 = arith.constant 0 : i32
    %c0_i32_1 = arith.constant 0 : i32
    return %c0_i32, %c0_i32_0 : i32, i32
  }
  func.func @transform_4(%arg0: i32) -> (i32, i32) {
    %c0_i32 = arith.constant 0 : i32
    %c0_i32_0 = arith.constant 0 : i32
    %c0_i32_1 = arith.constant 0 : i32
    return %c0_i32, %c0_i32_0 : i32, i32
  }
  func.func @transform_5(%arg0: i32) -> (i32, i32) {
    %c0_i32 = arith.constant 0 : i32
    %c0_i32_0 = arith.constant 0 : i32
    %c0_i32_1 = arith.constant 0 : i32
    return %c0_i32, %c0_i32_0 : i32, i32
  }
  func.func @transform_6(%arg0: i32) -> (i32, i32) {
    %c0_i32 = arith.constant 0 : i32
    %c0_i32_0 = arith.constant 0 : i32
    %c0_i32_1 = arith.constant 0 : i32
    return %c0_i32, %c0_i32_0 : i32, i32
  }
  func.func @transform_7(%arg0: i32) -> (i32, i32) {
    %c0_i32 = arith.constant 0 : i32
    %c0_i32_0 = arith.constant 0 : i32
    %c0_i32_1 = arith.constant 0 : i32
    return %c0_i32, %c0_i32_0 : i32, i32
  }
  func.func @transform_8(%arg0: i32) -> (i32, i32) {
    %c0_i32 = arith.constant 0 : i32
    %c0_i32_0 = arith.constant 0 : i32
    %c0_i32_1 = arith.constant 0 : i32
    return %c0_i32, %c0_i32_0 : i32, i32
  }
  func.func @transform_9(%arg0: i32) -> (i32, i32) {
    %c0_i32 = arith.constant 0 : i32
    %c0_i32_0 = arith.constant 0 : i32
    %c0_i32_1 = arith.constant 0 : i32
    return %c0_i32, %c0_i32_0 : i32, i32
  }
  func.func @transform_10(%arg0: i32) -> (i32, i32) {
    %c0_i32 = arith.constant 0 : i32
    %c0_i32_0 = arith.constant 0 : i32
    %c0_i32_1 = arith.constant 0 : i32
    return %c0_i32, %c0_i32_0 : i32, i32
  }
  func.func @transform_11(%arg0: i32) -> (i32, i32) {
    %c0_i32 = arith.constant 0 : i32
    %c0_i32_0 = arith.constant 0 : i32
    return %arg0, %c0_i32 : i32, i32
  }
}

</mosaic_0001>

<bundles_post_ra>
// kernel: tpu_custom_call.1
= control target key start
LH: loop header
LB: loop body
LE: loop exit
PB: predicated region body
PF: predicated region fallthrough
CT: control target
= control target key end

     0   :  { %v2736_v3 = vmov 0.0   ;;  %vm120_vm0 = vcmask 261120   ;;  %vm1003_vm1 = vcmask 785408   ;;  %vm1596_vm2 = vcmask 523264   ;;  %s4042_s3 = inlined_call_operand.vmem [shape: f32[32,224], index: 3, kind: input, shape index: {}]   ;;  %s4043_s2 = inlined_call_operand.vmem [shape: f32[32,224], index: 2, kind: input, shape index: {}]   ;;  %s4044_s1 = inlined_call_operand.vmem [shape: f32[256,32], index: 1, kind: input, shape index: {}]   ;;  %s4045_s0 = inlined_call_operand.vmem [shape: f32[256,32], index: 0, kind: input, shape index: {}]   ;;  %s4046_s5 = inlined_call_operand.vmem [shape: f32[96,256], index: 5, kind: input, shape index: {}]   ;;  %s4047_s4 = inlined_call_operand.vmem [shape: f32[1,224], index: 4, kind: input, shape index: {}]   ;;  %s4048_s7 = inlined_call_operand.vmem [shape: f32[64,32], index: 7, kind: input, shape index: {}]   ;;  %s4049_s9 = inlined_call_operand.vmem [shape: f32[32,1], index: 9, kind: input, shape index: {}]   ;;  %s4050_s6 = inlined_call_operand.vmem [shape: f32[1,256], index: 6, kind: input, shape index: {}]   ;;  %s4051_s8 = inlined_call_operand.vmem [shape: f32[1,32], index: 8, kind: input, shape index: {}]   ;;  %s4052_s10 = inlined_call_operand.<no memory space> [shape: f32[1,1], index: 10, kind: input, shape index: {}]   ;;  %s4053_s11 = inlined_call_operand.vmem [shape: f32[256,1], index: 11, kind: output, shape index: {}]  }
   0x1   :  { %v113_v0 = vld [vmem:[%s4042_s3 + $0x8] sm:$0xff]  ;;  %v115_v1 = vld [vmem:[%s4042_s3 + $0x18] sm:$0xff]  ;;  %v112_v2 = vld [vmem:[%s4042_s3] sm:$0xff]  ;;  %281 = vmatprep.mubr.f32.mxu0 %v2736_v3  ;;  %425 = vmatprep.mubr.f32.mxu1 %v2736_v3  ;;  %vm2014_vm3 = vcmask 130112   ;;  %vm2021_vm4 = vcmask 195712   ;;  %vm2028_vm5 = vcmask 261312  }
   0x2   :  { %v2480_v4 = vpack.c.bf16 %v115_v1, %v113_v0  ;;  %v114_v5 = vld [vmem:[%s4042_s3 + $0x10] sm:$0xff]  ;;  %v117_v6 = vld [vmem:[%s4042_s3 + $0x28] sm:$0xff]  ;;  %v119_v7 = vld [vmem:[%s4042_s3 + $0x38] sm:$0xff]  ;;  %vm2209_vm6 = vcmask 7168  }
   0x3   :  { %v2482_v8 = vpack.c.bf16 %v114_v5, %v112_v2  ;;  %v2484_v9 = vpack.c.bf16 %v119_v7, %v117_v6  ;;  %v116_v10 = vld [vmem:[%s4042_s3 + $0x20] sm:$0xff]  ;;  %v118_v11 = vld [vmem:[%s4042_s3 + $0x30] sm:$0xff]  ;;  %v105_v12 = vld [vmem:[%s4043_s2 + $0x8] sm:$0xff] }
   0x4   :  { %2481 = vmatprep.subr.bf16.mxu0 %v2480_v4  ;;  %v107_v13 = vld [vmem:[%s4043_s2 + $0x18] sm:$0xff]  ;;  %2536 = vmatprep.subr.bf16.mxu1 %v2480_v4  ;;  %v2486_v14 = vpack.c.bf16 %v118_v11, %v116_v10  ;;  %v104_v16 = vld [vmem:[%s4043_s2] sm:$0xff]  ;;  %v106_v17 = vld [vmem:[%s4043_s2 + $0x10] sm:$0xff] }
   0x5   :  { %2483 = vmatpush1.bf16.msra.mxu0 %v2482_v8  ;;  %2538 = vmatpush1.bf16.msra.mxu1 %v2482_v8  ;;  %v2488_v15 = vpack.c.bf16 %v107_v13, %v105_v12  ;;  %v72_v18 = vld [vmem:[%s4044_s1] sm:$0xff]  ;;  %v2490_v19 = vpack.c.bf16 %v106_v17, %v104_v16  ;;  %v109_v20 = vld [vmem:[%s4043_s2 + $0x28] sm:$0xff]  ;;  %v111_v21 = vld [vmem:[%s4043_s2 + $0x38] sm:$0xff] }
   0x6   :  { %2485 = vmatprep.subr.bf16.mxu0 %v2484_v9  ;;  %2537 = vmatprep.subr.bf16.mxu1 %v2484_v9  ;;  %v2492_v22 = vpack.c.bf16 %v111_v21, %v109_v20  ;;  %v108_v23 = vld [vmem:[%s4043_s2 + $0x20] sm:$0xff]  ;;  %v110_v24 = vld [vmem:[%s4043_s2 + $0x30] sm:$0xff]  ;;  %v73_v25 = vld [vmem:[%s4044_s1 + $0x8] sm:$0xff] }
   0x7   :  { %v2494_v26 = vpack.c.bf16 %v110_v24, %v108_v23  ;;  %v74_v27 = vld [vmem:[%s4044_s1 + $0x10] sm:$0xff]  ;;  %v75_v28 = vld [vmem:[%s4044_s1 + $0x18] sm:$0xff]  ;;  %v76_v29 = vld [vmem:[%s4044_s1 + $0x20] sm:$0xff] }
   0x8   :  { %v77_v30 = vld [vmem:[%s4044_s1 + $0x28] sm:$0xff]  ;;  %v78_v31 = vld [vmem:[%s4044_s1 + $0x30] sm:$0xff]  ;;  %v79_v32 = vld [vmem:[%s4044_s1 + $0x38] sm:$0xff] }
   0x9   :  { %2487 = vmatpush1.bf16.msra.mxu0 %v2486_v14  ;;  %2539 = vmatpush1.bf16.msra.mxu1 %v2486_v14  ;;  %v80_v33 = vld [vmem:[%s4044_s1 + $0x40] sm:$0xff]  ;;  %v81_v34 = vld [vmem:[%s4044_s1 + $0x48] sm:$0xff]  ;;  %v82_v35 = vld [vmem:[%s4044_s1 + $0x50] sm:$0xff] }
   0xa   :  { %2489 = vmatprep.subr.bf16.mxu0 %v2488_v15  ;;  %v83_v36 = vld [vmem:[%s4044_s1 + $0x58] sm:$0xff]  ;;  %v84_v37 = vld [vmem:[%s4044_s1 + $0x60] sm:$0xff]  ;;  %v85_v38 = vld [vmem:[%s4044_s1 + $0x68] sm:$0xff] }
   0xb   :  { %v86_v39 = vld [vmem:[%s4044_s1 + $0x70] sm:$0xff]  ;;  %v87_v40 = vld [vmem:[%s4044_s1 + $0x78] sm:$0xff]  ;;  %v88_v41 = vld [vmem:[%s4044_s1 + $0x80] sm:$0xff] }
   0xc   :  { %2246 = vmatmul.mubr.msk.f32.vlgmr.msra.gmra.mrb[0].mxu0 %vm120_vm0, %v72_v18  ;;  %v96_v42 = vld [vmem:[%s4044_s1 + $0xc0] sm:$0xff]  ;;  %v89_v43 = vld [vmem:[%s4044_s1 + $0x88] sm:$0xff]  ;;  %v90_v45 = vld [vmem:[%s4044_s1 + $0x90] sm:$0xff] }
   0xd   :  { %2491 = vmatpush1.bf16.msra.mxu0 %v2490_v19  ;;  %287 = vmatprep.mubr.f32.mxu0 %v2736_v3  ;;  %v97_v44 = vld [vmem:[%s4044_s1 + $0xc8] sm:$0xff]  ;;  %v98_v46 = vld [vmem:[%s4044_s1 + $0xd0] sm:$0xff]  ;;  %v91_v47 = vld [vmem:[%s4044_s1 + $0x98] sm:$0xff] }
   0xe   :  { %2493 = vmatprep.subr.bf16.mxu0 %v2492_v22  ;;  %2270 = vmatmul.mubr.msk.f32.vlgmr.msra.gmra.mrb[0].mxu1 %vm120_vm0, %v96_v42  ;;  %v99_v48 = vld [vmem:[%s4044_s1 + $0xd8] sm:$0xff]  ;;  %v92_v49 = vld [vmem:[%s4044_s1 + $0xa0] sm:$0xff]  ;;  %v93_v51 = vld [vmem:[%s4044_s1 + $0xa8] sm:$0xff] }
   0xf   :  { %431 = vmatprep.mubr.f32.mxu1 %v2736_v3  ;;  %v100_v50 = vld [vmem:[%s4044_s1 + $0xe0] sm:$0xff]  ;;  %v101_v52 = vld [vmem:[%s4044_s1 + $0xe8] sm:$0xff]  ;;  %v94_v53 = vld [vmem:[%s4044_s1 + $0xb0] sm:$0xff] }
  0x10   :  { %2247 = vmatmul.mubr.msk.f32.gmra.mrb[2].mxu0 %vm120_vm0, %v73_v25  ;;  %v102_v54 = vld [vmem:[%s4044_s1 + $0xf0] sm:$0xff]  ;;  %v95_v55 = vld [vmem:[%s4044_s1 + $0xb8] sm:$0xff]  ;;  %v40_v57 = vld [vmem:[%s4045_s0] sm:$0xff] }
  0x11   :  { %293 = vmatprep.mubr.f32.mxu0 %v2736_v3  ;;  %2495 = vmatpush1.bf16.msra.mxu0 %v2494_v26  ;;  %v103_v56 = vld [vmem:[%s4044_s1 + $0xf8] sm:$0xff]  ;;  %v968_v58 = vld [vmem:[%s4046_s5 + $0x8] sm:$0xff]  ;;  %v967_v60 = vld [vmem:[%s4046_s5] sm:$0xff] }
  0x12   :  { %2271 = vmatmul.mubr.msk.f32.gmra.mrb[2].mxu1 %vm120_vm0, %v97_v44  ;;  %v970_v59 = vld [vmem:[%s4046_s5 + $0x18] sm:$0xff]  ;;  %v969_v62 = vld [vmem:[%s4046_s5 + $0x10] sm:$0xff]  ;;  %v972_v63 = vld [vmem:[%s4046_s5 + $0x28] sm:$0xff] }
  0x13   :  { %437 = vmatprep.mubr.f32.mxu1 %v2736_v3  ;;  %v2496_v61 = vpack.c.bf16 %v970_v59, %v968_v58  ;;  %v974_v0 = vld [vmem:[%s4046_s5 + $0x38] sm:$0xff]  ;;  %v2498_v1 = vpack.c.bf16 %v969_v62, %v967_v60  ;;  %v971_v4 = vld [vmem:[%s4046_s5 + $0x20] sm:$0xff]  ;;  %v973_v5 = vld [vmem:[%s4046_s5 + $0x30] sm:$0xff] }
  0x14   :  { %2248 = vmatmul.mubr.msk.f32.gmra.mrb[4].mxu0 %vm120_vm0, %v74_v27  ;;  %v2500_v2 = vpack.c.bf16 %v974_v0, %v972_v63  ;;  %v976_v6 = vld [vmem:[%s4046_s5 + $0x48] sm:$0xff]  ;;  %v978_v7 = vld [vmem:[%s4046_s5 + $0x58] sm:$0xff]  ;;  %v2502_v9 = vpack.c.bf16 %v973_v5, %v971_v4  ;;  %v975_v11 = vld [vmem:[%s4046_s5 + $0x40] sm:$0xff] }
  0x15   :  { %299 = vmatprep.mubr.f32.mxu0 %v2736_v3  ;;  %2497 = vmatprep.subr.bf16.mxu1 %v2496_v61  ;;  %v41_v8 = vld [vmem:[%s4045_s0 + $0x8] sm:$0xff]  ;;  %v2504_v10 = vpack.c.bf16 %v978_v7, %v976_v6  ;;  %v977_v12 = vld [vmem:[%s4046_s5 + $0x50] sm:$0xff]  ;;  %v982_v14 = vld [vmem:[%s4046_s5 + $0x78] sm:$0xff] }
  0x16   :  { %2272 = vmatmul.mubr.msk.f32.gmra.mrb[4].mxu1 %vm120_vm0, %v98_v46  ;;  %v980_v13 = vld [vmem:[%s4046_s5 + $0x68] sm:$0xff]  ;;  %v42_v15 = vld [vmem:[%s4045_s0 + $0x10] sm:$0xff]  ;;  %v2506_v16 = vpack.c.bf16 %v977_v12, %v975_v11  ;;  %v979_v18 = vld [vmem:[%s4046_s5 + $0x60] sm:$0xff] }
  0x17   :  { %443 = vmatprep.mubr.f32.mxu1 %v2736_v3  ;;  %2499 = vmatpush1.bf16.msra.mxu1 %v2498_v1  ;;  %v2508_v17 = vpack.c.bf16 %v982_v14, %v980_v13  ;;  %v981_v19 = vld [vmem:[%s4046_s5 + $0x70] sm:$0xff]  ;;  %v984_v20 = vld [vmem:[%s4046_s5 + $0x88] sm:$0xff]  ;;  %v986_v21 = vld [vmem:[%s4046_s5 + $0x98] sm:$0xff] }
  0x18   :  { %2249 = vmatmul.mubr.msk.f32.gmra.mrb[6].mxu0 %vm120_vm0, %v75_v28  ;;  %2501 = vmatprep.subr.bf16.mxu1 %v2500_v2  ;;  %v43_v22 = vld [vmem:[%s4045_s0 + $0x18] sm:$0xff]  ;;  %v2510_v23 = vpack.c.bf16 %v981_v19, %v979_v18  ;;  %v2512_v24 = vpack.c.bf16 %v986_v21, %v984_v20  ;;  %v983_v25 = vld [vmem:[%s4046_s5 + $0x80] sm:$0xff]  ;;  %v985_v26 = vld [vmem:[%s4046_s5 + $0x90] sm:$0xff] }
  0x19   :  { %305 = vmatprep.mubr.f32.mxu0 %v2736_v3  ;;  %v44_v27 = vld [vmem:[%s4045_s0 + $0x20] sm:$0xff]  ;;  %v2514_v28 = vpack.c.bf16 %v985_v26, %v983_v25  ;;  %v58_v42 = vld [vmem:[%s4045_s0 + $0x90] sm:$0xff]  ;;  %v988_v46 = vld [vmem:[%s4046_s5 + $0xa8] sm:$0xff] }
  0x1a   :  { %2273 = vmatmul.mubr.msk.f32.gmra.mrb[6].mxu1 %vm120_vm0, %v99_v48  ;;  %v60_v44 = vld [vmem:[%s4045_s0 + $0xa0] sm:$0xff]  ;;  %v69_v59 = vld [vmem:[%s4045_s0 + $0xe8] sm:$0xff]  ;;  %v70_v60 = vld [vmem:[%s4045_s0 + $0xf0] sm:$0xff] }
  0x1b   :  { %449 = vmatprep.mubr.f32.mxu1 %v2736_v3  ;;  %2503 = vmatpush1.bf16.msra.mxu1 %v2502_v9  ;;  %v68_v58 = vld [vmem:[%s4045_s0 + $0xe0] sm:$0xff]  ;;  %v71_v61 = vld [vmem:[%s4045_s0 + $0xf8] sm:$0xff]  ;;  %v829_v9 = vlaneseq }
  0x1c   :  { %2250 = vmatmul.mubr.msk.f32.gmra.mrb[8].mxu0 %vm120_vm0, %v76_v29  ;;  %2505 = vmatprep.subr.bf16.mxu1 %v2504_v10  ;;  %v45_v29 = vld [vmem:[%s4045_s0 + $0x28] sm:$0xff]  ;;  %v1581_v26 = vld [vmem:[%s4048_s7] sm:$0xff] }
  0x1d   :  { %311 = vmatprep.mubr.f32.mxu0 %v2736_v3  ;;  %v3264_v12 = vshrl.u32 %v829_v9, 7 }
  0x1e   :  { %2274 = vmatmul.mubr.msk.f32.gmra.mrb[8].mxu1 %vm120_vm0, %v100_v50  ;;  %v989_v50 = vld [vmem:[%s4046_s5 + $0xb0] sm:$0xff] }
  0x1f   :  { %455 = vmatprep.mubr.f32.mxu1 %v2736_v3  ;;  %2507 = vmatpush1.bf16.msra.mxu1 %v2506_v16  ;;  %v3274_v16 = vld [vmem:[%s4047_s4] sm:$0x3] }
  0x20   :  { %2251 = vmatmul.mubr.msk.f32.gmra.mrb[10].mxu0 %vm120_vm0, %v77_v30  ;;  %2509 = vmatprep.subr.bf16.mxu1 %v2508_v17  ;;  %v46_v30 = vld [vmem:[%s4045_s0 + $0x30] sm:$0xff] }
  0x21   :  { %317 = vmatprep.mubr.f32.mxu0 %v2736_v3 }
  0x22   :  { %2275 = vmatmul.mubr.msk.f32.gmra.mrb[10].mxu1 %vm120_vm0, %v101_v52  ;;  %v62_v52 = vld [vmem:[%s4045_s0 + $0xb0] sm:$0xff] }
  0x23   :  { %461 = vmatprep.mubr.f32.mxu1 %v2736_v3  ;;  %2511 = vmatpush1.bf16.msra.mxu1 %v2510_v23 }
  0x24   :  { %2252 = vmatmul.mubr.msk.f32.gmra.mrb[12].mxu0 %vm120_vm0, %v78_v31  ;;  %2513 = vmatprep.subr.bf16.mxu1 %v2512_v24  ;;  %v47_v31 = vld [vmem:[%s4045_s0 + $0x38] sm:$0xff] }
  0x25   :  { %323 = vmatprep.mubr.f32.mxu0 %v2736_v3 }
  0x26   :  { %2276 = vmatmul.mubr.msk.f32.gmra.mrb[12].mxu1 %vm120_vm0, %v102_v54  ;;  %v64_v54 = vld [vmem:[%s4045_s0 + $0xc0] sm:$0xff] }
  0x27   :  { %467 = vmatprep.mubr.f32.mxu1 %v2736_v3  ;;  %2515 = vmatpush1.bf16.msra.mxu1 %v2514_v28  ;;  %v1583_v28 = vld [vmem:[%s4048_s7 + $0x10] sm:$0xff] }
  0x28   :  { %2253 = vmatmul.mubr.msk.f32.gmra.mrb[14].mxu0 %vm120_vm0, %v79_v32  ;;  %v48_v32 = vld [vmem:[%s4045_s0 + $0x40] sm:$0xff] }
  0x29   :  { %329 = vmatprep.mubr.f32.mxu0 %v2736_v3 }
  0x2a   :  { %2277 = vmatmul.mubr.msk.f32.gmra.mrb[14].mxu1 %vm120_vm0, %v103_v56  ;;  %v66_v56 = vld [vmem:[%s4045_s0 + $0xd0] sm:$0xff] }
  0x2b   :  { %1164 = vmatprep.mubr.f32.mxu1 %v2736_v3 }
  0x2c   :  { %2254 = vmatmul.mubr.msk.f32.gmra.mrb[16].mxu0 %vm120_vm0, %v80_v33  ;;  %v49_v33 = vld [vmem:[%s4045_s0 + $0x48] sm:$0xff] }
  0x2d   :  { %335 = vmatprep.mubr.f32.mxu0 %v2736_v3 }
  0x30   :  { %2255 = vmatmul.mubr.msk.f32.gmra.mrb[18].mxu0 %vm120_vm0, %v81_v34  ;;  %v50_v34 = vld [vmem:[%s4045_s0 + $0x50] sm:$0xff] }
  0x31   :  { %341 = vmatprep.mubr.f32.mxu0 %v2736_v3 }
  0x34   :  { %2256 = vmatmul.mubr.msk.f32.gmra.mrb[20].mxu0 %vm120_vm0, %v82_v35  ;;  %v51_v35 = vld [vmem:[%s4045_s0 + $0x58] sm:$0xff] }
  0x35   :  { %347 = vmatprep.mubr.f32.mxu0 %v2736_v3 }
  0x38   :  { %2257 = vmatmul.mubr.msk.f32.gmra.mrb[22].mxu0 %vm120_vm0, %v83_v36  ;;  %v52_v36 = vld [vmem:[%s4045_s0 + $0x60] sm:$0xff] }
  0x39   :  { %353 = vmatprep.mubr.f32.mxu0 %v2736_v3 }
  0x3c   :  { %2258 = vmatmul.mubr.msk.f32.gmra.mrb[24].mxu0 %vm120_vm0, %v84_v37  ;;  %v53_v37 = vld [vmem:[%s4045_s0 + $0x68] sm:$0xff] }
  0x3d   :  { %359 = vmatprep.mubr.f32.mxu0 %v2736_v3 }
  0x40   :  { %2259 = vmatmul.mubr.msk.f32.gmra.mrb[26].mxu0 %vm120_vm0, %v85_v38  ;;  %v54_v38 = vld [vmem:[%s4045_s0 + $0x70] sm:$0xff] }
  0x41   :  { %365 = vmatprep.mubr.f32.mxu0 %v2736_v3 }
  0x44   :  { %2260 = vmatmul.mubr.msk.f32.gmra.mrb[28].mxu0 %vm120_vm0, %v86_v39  ;;  %v55_v39 = vld [vmem:[%s4045_s0 + $0x78] sm:$0xff] }
  0x45   :  { %371 = vmatprep.mubr.f32.mxu0 %v2736_v3 }
  0x48   :  { %2261 = vmatmul.mubr.msk.f32.gmra.mrb[30].mxu0 %vm120_vm0, %v87_v40  ;;  %v56_v40 = vld [vmem:[%s4045_s0 + $0x80] sm:$0xff] }
  0x49   :  { %377 = vmatprep.mubr.f32.mxu0 %v2736_v3 }
  0x4c   :  { %2262 = vmatmul.mubr.msk.f32.gmra.mrb[32].mxu0 %vm120_vm0, %v88_v41  ;;  %v57_v41 = vld [vmem:[%s4045_s0 + $0x88] sm:$0xff] }
  0x4d   :  { %383 = vmatprep.mubr.f32.mxu0 %v2736_v3 }
  0x50   :  { %2263 = vmatmul.mubr.msk.f32.gmra.mrb[34].mxu0 %vm120_vm0, %v89_v43  ;;  %v59_v43 = vld [vmem:[%s4045_s0 + $0x98] sm:$0xff] }
  0x51   :  { %389 = vmatprep.mubr.f32.mxu0 %v2736_v3 }
  0x54   :  { %2264 = vmatmul.mubr.msk.f32.gmra.mrb[36].mxu0 %vm120_vm0, %v90_v45  ;;  %v61_v45 = vld [vmem:[%s4045_s0 + $0xa8] sm:$0xff] }
  0x55   :  { %395 = vmatprep.mubr.f32.mxu0 %v2736_v3 }
  0x58   :  { %2265 = vmatmul.mubr.msk.f32.gmra.mrb[38].mxu0 %vm120_vm0, %v91_v47  ;;  %v990_v47 = vld [vmem:[%s4046_s5 + $0xb8] sm:$0xff] }
  0x59   :  { %401 = vmatprep.mubr.f32.mxu0 %v2736_v3  ;;  %v2516_v48 = vpack.c.bf16 %v990_v47, %v988_v46 }
  0x5b   :  { %2517 = vmatprep.subr.bf16.mxu1 %v2516_v48 }
  0x5c   :  { %2266 = vmatmul.mubr.msk.f32.gmra.mrb[40].mxu0 %vm120_vm0, %v92_v49  ;;  %v987_v49 = vld [vmem:[%s4046_s5 + $0xa0] sm:$0xff] }
  0x5d   :  { %407 = vmatprep.mubr.f32.mxu0 %v2736_v3 }
  0x60   :  { %2267 = vmatmul.mubr.msk.f32.gmra.mrb[42].mxu0 %vm120_vm0, %v93_v51  ;;  %v2518_v51 = vpack.c.bf16 %v989_v50, %v987_v49 }
  0x61   :  { %413 = vmatprep.mubr.f32.mxu0 %v2736_v3 }
  0x62   :  { %2519 = vmatpush1.bf16.msra.mxu1 %v2518_v51 }
  0x64   :  { %2268 = vmatmul.mubr.msk.f32.gmra.mrb[44].mxu0 %vm120_vm0, %v94_v53  ;;  %v63_v53 = vld [vmem:[%s4045_s0 + $0xb8] sm:$0xff] }
  0x65   :  { %419 = vmatprep.mubr.f32.mxu0 %v2736_v3 }
  0x68   :  { %2269 = vmatmul.mubr.msk.f32.gmra.mrb[46].mxu0 %vm120_vm0, %v95_v55  ;;  %v65_v55 = vld [vmem:[%s4045_s0 + $0xc8] sm:$0xff] }
  0x69   :  { %634 = vmatprep.mubr.f32.mxu0 %v2736_v3 }
  0x6c   :  { %2278 = vmatmul.mubr.msk.f32.vlgmr.msra.gmra.mrb[0].mxu0 %vm120_vm0, %v40_v57  ;;  %v67_v57 = vld [vmem:[%s4045_s0 + $0xd8] sm:$0xff] }
  0x6d   :  { %640 = vmatprep.mubr.f32.mxu0 %v2736_v3 }
  0x70   :  { %2279 = vmatmul.mubr.msk.f32.gmra.mrb[2].mxu0 %vm120_vm0, %v41_v8 }
  0x71   :  { %646 = vmatprep.mubr.f32.mxu0 %v2736_v3 }
  0x74   :  { %2280 = vmatmul.mubr.msk.f32.gmra.mrb[4].mxu0 %vm120_vm0, %v42_v15  ;;  %v835_v15 = vsub.s32 1, %v3264_v12 }
  0x75   :  { %652 = vmatprep.mubr.f32.mxu0 %v2736_v3 }
  0x76   :  { %v3283_v19 = vrot.slane %v3274_v16, %v835_v15 }
  0x78   :  { %2281 = vmatmul.mubr.msk.f32.gmra.mrb[6].mxu0 %vm120_vm0, %v43_v22 }
  0x79   :  { %658 = vmatprep.mubr.f32.mxu0 %v2736_v3 }
  0x7c   :  { %2282 = vmatmul.mubr.msk.f32.gmra.mrb[8].mxu0 %vm120_vm0, %v44_v27  ;;  %v1582_v27 = vld [vmem:[%s4048_s7 + $0x8] sm:$0xff] }
  0x7d   :  { %664 = vmatprep.mubr.f32.mxu0 %v2736_v3 }
  0x80   :  { %2283 = vmatmul.mubr.msk.f32.gmra.mrb[10].mxu0 %vm120_vm0, %v45_v29 }
  0x81   :  { %670 = vmatprep.mubr.f32.mxu0 %v2736_v3 }
  0x84   :  { %2284 = vmatmul.mubr.msk.f32.gmra.mrb[12].mxu0 %vm120_vm0, %v46_v30  ;;  %v2520_v30 = vpack.c.bf16 %v1582_v27, %v1581_v26 }
  0x85   :  { %676 = vmatprep.mubr.f32.mxu0 %v2736_v3 }
  0x86   :  { %2521 = vmatprep.subr.bf16.mxu1 %v2520_v30 }
  0x88   :  { %2285 = vmatmul.mubr.msk.f32.gmra.mrb[14].mxu0 %vm120_vm0, %v47_v31  ;;  %v1584_v31 = vld [vmem:[%s4048_s7 + $0x18] sm:$0xff] }
  0x89   :  { %682 = vmatprep.mubr.f32.mxu0 %v2736_v3 }
  0x8c   :  { %2286 = vmatmul.mubr.msk.f32.gmra.mrb[16].mxu0 %vm120_vm0, %v48_v32  ;;  %v2524_v32 = vpack.c.bf16 %v1584_v31, %v1583_v28 }
  0x8d   :  { %688 = vmatprep.mubr.f32.mxu0 %v2736_v3 }
  0x90   :  { %2287 = vmatmul.mubr.msk.f32.gmra.mrb[18].mxu0 %vm120_vm0, %v49_v33 }
  0x91   :  { %694 = vmatprep.mubr.f32.mxu0 %v2736_v3 }
  0x94   :  { %2288 = vmatmul.mubr.msk.f32.gmra.mrb[20].mxu0 %vm120_vm0, %v50_v34 }
  0x95   :  { %700 = vmatprep.mubr.f32.mxu0 %v2736_v3 }
  0x98   :  { %2289 = vmatmul.mubr.msk.f32.gmra.mrb[22].mxu0 %vm120_vm0, %v51_v35 }
  0x99   :  { %706 = vmatprep.mubr.f32.mxu0 %v2736_v3 }
  0x9c   :  { %2290 = vmatmul.mubr.msk.f32.gmra.mrb[24].mxu0 %vm120_vm0, %v52_v36 }
  0x9d   :  { %712 = vmatprep.mubr.f32.mxu0 %v2736_v3 }
  0xa0   :  { %2291 = vmatmul.mubr.msk.f32.gmra.mrb[26].mxu0 %vm120_vm0, %v53_v37 }
  0xa1   :  { %718 = vmatprep.mubr.f32.mxu0 %v2736_v3 }
  0xa4   :  { %2292 = vmatmul.mubr.msk.f32.gmra.mrb[28].mxu0 %vm120_vm0, %v54_v38 }
  0xa5   :  { %724 = vmatprep.mubr.f32.mxu0 %v2736_v3 }
  0xa8   :  { %2293 = vmatmul.mubr.msk.f32.gmra.mrb[30].mxu0 %vm120_vm0, %v55_v39 }
  0xa9   :  { %730 = vmatprep.mubr.f32.mxu0 %v2736_v3 }
  0xac   :  { %2294 = vmatmul.mubr.msk.f32.gmra.mrb[32].mxu0 %vm120_vm0, %v56_v40 }
  0xad   :  { %736 = vmatprep.mubr.f32.mxu0 %v2736_v3 }
  0xb0   :  { %2295 = vmatmul.mubr.msk.f32.gmra.mrb[34].mxu0 %vm120_vm0, %v57_v41 }
  0xb1   :  { %742 = vmatprep.mubr.f32.mxu0 %v2736_v3 }
  0xb4   :  { %2296 = vmatmul.mubr.msk.f32.gmra.mrb[36].mxu0 %vm120_vm0, %v58_v42 }
  0xb5   :  { %748 = vmatprep.mubr.f32.mxu0 %v2736_v3 }
  0xb8   :  { %2297 = vmatmul.mubr.msk.f32.gmra.mrb[38].mxu0 %vm120_vm0, %v59_v43 }
  0xb9   :  { %754 = vmatprep.mubr.f32.mxu0 %v2736_v3 }
  0xbc   :  { %2298 = vmatmul.mubr.msk.f32.gmra.mrb[40].mxu0 %vm120_vm0, %v60_v44 }
  0xbd   :  { %760 = vmatprep.mubr.f32.mxu0 %v2736_v3 }
  0xc0   :  { %2299 = vmatmul.mubr.msk.f32.gmra.mrb[42].mxu0 %vm120_vm0, %v61_v45 }
  0xc1   :  { %766 = vmatprep.mubr.f32.mxu0 %v2736_v3 }
  0xc4   :  { %2300 = vmatmul.mubr.msk.f32.gmra.mrb[44].mxu0 %vm120_vm0, %v62_v52 }
  0xc5   :  { %772 = vmatprep.mubr.f32.mxu0 %v2736_v3 }
  0xc8   :  { %2301 = vmatmul.mubr.msk.f32.gmra.mrb[46].mxu0 %vm120_vm0, %v63_v53 }
  0xc9   :  { %778 = vmatprep.mubr.f32.mxu0 %v2736_v3 }
  0xcc   :  { %2302 = vmatmul.mubr.msk.f32.gmra.mrb[48].mxu0 %vm120_vm0, %v64_v54 }
  0xcd   :  { %784 = vmatprep.mubr.f32.mxu0 %v2736_v3 }
  0xd0   :  { %2303 = vmatmul.mubr.msk.f32.gmra.mrb[50].mxu0 %vm120_vm0, %v65_v55 }
  0xd1   :  { %790 = vmatprep.mubr.f32.mxu0 %v2736_v3 }
  0xd4   :  { %2304 = vmatmul.mubr.msk.f32.gmra.mrb[52].mxu0 %vm120_vm0, %v66_v56 }
  0xd5   :  { %796 = vmatprep.mubr.f32.mxu0 %v2736_v3 }
  0xd8   :  { %2305 = vmatmul.mubr.msk.f32.gmra.mrb[54].mxu0 %vm120_vm0, %v67_v57 }
  0xd9   :  { %802 = vmatprep.mubr.f32.mxu0 %v2736_v3 }
  0xdc   :  { %2306 = vmatmul.mubr.msk.f32.gmra.mrb[56].mxu0 %vm120_vm0, %v68_v58 }
  0xdd   :  { %808 = vmatprep.mubr.f32.mxu0 %v2736_v3 }
  0xe0   :  { %2307 = vmatmul.mubr.msk.f32.gmra.mrb[58].mxu0 %vm120_vm0, %v69_v59 }
  0xe1   :  { %814 = vmatprep.mubr.f32.mxu0 %v2736_v3  ;;  %v3239_v62 = vpop.f32.mrb[0].mxu1 }
  0xe2   :  { %v3241_v63 = vpop.f32.mrb[1].mxu1 }
  0xe4   :  { %2308 = vmatmul.mubr.msk.f32.gmra.mrb[60].mxu0 %vm120_vm0, %v70_v60 }
  0xe5   :  { %820 = vmatprep.mubr.f32.mxu0 %v2736_v3  ;;  %v3243_v0 = vpop.f32.mrb[2].mxu1 }
  0xe6   :  { %v3245_v1 = vpop.f32.mrb[3].mxu1 }
  0xe8   :  { %2309 = vmatmul.mubr.msk.f32.gmra.mrb[62].mxu0 %vm120_vm0, %v71_v61 }
  0xe9   :  { %v3247_v2 = vpop.f32.mrb[4].mxu1 }
  0xea   :  { %v3249_v4 = vpop.f32.mrb[5].mxu1 }
  0xed   :  { %v3251_v5 = vpop.f32.mrb[6].mxu1 }
  0xee   :  { %v3253_v6 = vpop.f32.mrb[7].mxu1 }
  0xf1   :  { %v3255_v7 = vpop.f32.mrb[8].mxu1 }
  0xf2   :  { %v3257_v8 = vpop.f32.mrb[9].mxu1 }
  0xf5   :  { %v3259_v10 = vpop.f32.mrb[10].mxu1 }
  0xf6   :  { %v3261_v11 = vpop.f32.mrb[11].mxu1 }
  0xf9   :  { %v3266_v13 = vpop.f32.mrb[12].mxu1 }
  0xfa   :  { %v3268_v14 = vpop.f32.mrb[13].mxu1 }
  0xfd   :  { %v3276_v17 = vpop.f32.mrb[14].mxu1 }
  0xfe   :  { %v3278_v18 = vpop.f32.mrb[15].mxu1 }
 0x13f   :  { %v3285_v20 = vpop.f32.mrb[0].mxu0 }
 0x140   :  { %v638_v21 = vpop.f32.mrb[1].mxu0 }
 0x141   :  { %v840_v22 = vadd.f32 %v3283_v19, %v638_v21 }
 0x143   :  { %v904_v23 = vmax.f32 %v840_v22, 0.0  ;;  %v3288_v24 = vpop.f32.mrb[2].mxu0 }
 0x144   :  { %v644_v25 = vpop.f32.mrb[3].mxu0 }
 0x145   :  { %v842_v29 = vadd.f32 %v3283_v19, %v644_v25  ;;  %2310 = vmatmul.mubr.msk.f32.vlgmr.msra.gmra.mrb[16].mxu1 %vm1003_vm1, %v904_v23 }
 0x146   :  { %1170 = vmatprep.mubr.f32.mxu1 %v2736_v3  ;;  %2523 = vmatpush3.bf16.msra.mxu1 %v2520_v30 }
 0x147   :  { %v906_v33 = vmax.f32 %v842_v29, 0.0  ;;  %v3305_v34 = vpop.f32.mrb[4].mxu0  ;;  %2525 = vmatprep.subr.bf16.mxu1 %v2524_v32 }
 0x148   :  { %v650_v35 = vpop.f32.mrb[5].mxu0 }
 0x149   :  { %v844_v36 = vadd.f32 %v3283_v19, %v650_v35  ;;  %2311 = vmatmul.mubr.msk.f32.gmra.mrb[18].mxu1 %vm1003_vm1, %v906_v33 }
 0x14a   :  { %1176 = vmatprep.mubr.f32.mxu1 %v2736_v3  ;;  %2527 = vmatpush3.bf16.msra.mxu1 %v2524_v32 }
 0x14b   :  { %v908_v37 = vmax.f32 %v844_v36, 0.0  ;;  %v3310_v38 = vpop.f32.mrb[6].mxu0 }
 0x14c   :  { %v656_v39 = vpop.f32.mrb[7].mxu0 }
 0x14d   :  { %v846_v40 = vadd.f32 %v3283_v19, %v656_v39  ;;  %2312 = vmatmul.mubr.msk.f32.gmra.mrb[20].mxu1 %vm1003_vm1, %v908_v37 }
 0x14e   :  { %1182 = vmatprep.mubr.f32.mxu1 %v2736_v3 }
 0x14f   :  { %v910_v41 = vmax.f32 %v846_v40, 0.0  ;;  %v3315_v42 = vpop.f32.mrb[8].mxu0 }
 0x150   :  { %v662_v43 = vpop.f32.mrb[9].mxu0 }
 0x151   :  { %v848_v44 = vadd.f32 %v3283_v19, %v662_v43  ;;  %2313 = vmatmul.mubr.msk.f32.gmra.mrb[22].mxu1 %vm1003_vm1, %v910_v41 }
 0x152   :  { %1188 = vmatprep.mubr.f32.mxu1 %v2736_v3 }
 0x153   :  { %v912_v45 = vmax.f32 %v848_v44, 0.0  ;;  %v3320_v46 = vpop.f32.mrb[10].mxu0 }
 0x154   :  { %v668_v47 = vpop.f32.mrb[11].mxu0 }
 0x155   :  { %v850_v48 = vadd.f32 %v3283_v19, %v668_v47  ;;  %2314 = vmatmul.mubr.msk.f32.gmra.mrb[24].mxu1 %vm1003_vm1, %v912_v45 }
 0x156   :  { %1194 = vmatprep.mubr.f32.mxu1 %v2736_v3 }
 0x157   :  { %v914_v49 = vmax.f32 %v850_v48, 0.0  ;;  %v3325_v50 = vpop.f32.mrb[12].mxu0 }
 0x158   :  { %v674_v51 = vpop.f32.mrb[13].mxu0 }
 0x159   :  { %v852_v52 = vadd.f32 %v3283_v19, %v674_v51  ;;  %2315 = vmatmul.mubr.msk.f32.gmra.mrb[26].mxu1 %vm1003_vm1, %v914_v49 }
 0x15a   :  { %1200 = vmatprep.mubr.f32.mxu1 %v2736_v3 }
 0x15b   :  { %v916_v53 = vmax.f32 %v852_v52, 0.0  ;;  %v3330_v54 = vpop.f32.mrb[14].mxu0 }
 0x15c   :  { %v680_v55 = vpop.f32.mrb[15].mxu0 }
 0x15d   :  { %v854_v56 = vadd.f32 %v3283_v19, %v680_v55  ;;  %2316 = vmatmul.mubr.msk.f32.gmra.mrb[28].mxu1 %vm1003_vm1, %v916_v53 }
 0x15e   :  { %1206 = vmatprep.mubr.f32.mxu1 %v2736_v3 }
 0x15f   :  { %v918_v57 = vmax.f32 %v854_v56, 0.0  ;;  %v3335_v58 = vpop.f32.mrb[16].mxu0 }
 0x160   :  { %v686_v59 = vpop.f32.mrb[17].mxu0 }
 0x161   :  { %v856_v60 = vadd.f32 %v3283_v19, %v686_v59  ;;  %2317 = vmatmul.mubr.msk.f32.gmra.mrb[30].mxu1 %vm1003_vm1, %v918_v57 }
 0x162   :  { %1212 = vmatprep.mubr.f32.mxu1 %v2736_v3 }
 0x163   :  { %v920_v61 = vmax.f32 %v856_v60, 0.0  ;;  %v3340_v21 = vpop.f32.mrb[18].mxu0 }
 0x164   :  { %v692_v22 = vpop.f32.mrb[19].mxu0 }
 0x165   :  { %v858_v23 = vadd.f32 %v3283_v19, %v692_v22  ;;  %2318 = vmatmul.mubr.msk.f32.gmra.mrb[32].mxu1 %vm1003_vm1, %v920_v61 }
 0x166   :  { %1218 = vmatprep.mubr.f32.mxu1 %v2736_v3 }
 0x167   :  { %v922_v25 = vmax.f32 %v858_v23, 0.0  ;;  %v3345_v26 = vpop.f32.mrb[20].mxu0 }
 0x168   :  { %v698_v27 = vpop.f32.mrb[21].mxu0 }
 0x169   :  { %v860_v28 = vadd.f32 %v3283_v19, %v698_v27  ;;  %2319 = vmatmul.mubr.msk.f32.gmra.mrb[34].mxu1 %vm1003_vm1, %v922_v25 }
 0x16a   :  { %1224 = vmatprep.mubr.f32.mxu1 %v2736_v3 }
 0x16b   :  { %v924_v29 = vmax.f32 %v860_v28, 0.0  ;;  %v3350_v30 = vpop.f32.mrb[22].mxu0 }
 0x16c   :  { %v704_v31 = vpop.f32.mrb[23].mxu0 }
 0x16d   :  { %v862_v32 = vadd.f32 %v3283_v19, %v704_v31  ;;  %2320 = vmatmul.mubr.msk.f32.gmra.mrb[36].mxu1 %vm1003_vm1, %v924_v29 }
 0x16e   :  { %1230 = vmatprep.mubr.f32.mxu1 %v2736_v3 }
 0x16f   :  { %v926_v33 = vmax.f32 %v862_v32, 0.0  ;;  %v3355_v35 = vpop.f32.mrb[24].mxu0 }
 0x170   :  { %v710_v36 = vpop.f32.mrb[25].mxu0 }
 0x171   :  { %v864_v37 = vadd.f32 %v3283_v19, %v710_v36  ;;  %2321 = vmatmul.mubr.msk.f32.gmra.mrb[38].mxu1 %vm1003_vm1, %v926_v33 }
 0x172   :  { %1236 = vmatprep.mubr.f32.mxu1 %v2736_v3 }
 0x173   :  { %v928_v39 = vmax.f32 %v864_v37, 0.0  ;;  %v3360_v40 = vpop.f32.mrb[26].mxu0 }
 0x174   :  { %v716_v41 = vpop.f32.mrb[27].mxu0 }
 0x175   :  { %v866_v43 = vadd.f32 %v3283_v19, %v716_v41  ;;  %2322 = vmatmul.mubr.msk.f32.gmra.mrb[40].mxu1 %vm1003_vm1, %v928_v39 }
 0x176   :  { %1242 = vmatprep.mubr.f32.mxu1 %v2736_v3 }
 0x177   :  { %v930_v44 = vmax.f32 %v866_v43, 0.0  ;;  %v3365_v45 = vpop.f32.mrb[28].mxu0 }
 0x178   :  { %v722_v47 = vpop.f32.mrb[29].mxu0 }
 0x179   :  { %v868_v48 = vadd.f32 %v3283_v19, %v722_v47  ;;  %2323 = vmatmul.mubr.msk.f32.gmra.mrb[42].mxu1 %vm1003_vm1, %v930_v44 }
 0x17a   :  { %1248 = vmatprep.mubr.f32.mxu1 %v2736_v3 }
 0x17b   :  { %v932_v49 = vmax.f32 %v868_v48, 0.0  ;;  %v3370_v51 = vpop.f32.mrb[30].mxu0 }
 0x17c   :  { %v728_v52 = vpop.f32.mrb[31].mxu0 }
 0x17d   :  { %v870_v53 = vadd.f32 %v3283_v19, %v728_v52  ;;  %2324 = vmatmul.mubr.msk.f32.gmra.mrb[44].mxu1 %vm1003_vm1, %v932_v49 }
 0x17e   :  { %1254 = vmatprep.mubr.f32.mxu1 %v2736_v3 }
 0x17f   :  { %v934_v55 = vmax.f32 %v870_v53, 0.0  ;;  %v3375_v56 = vpop.f32.mrb[32].mxu0 }
 0x180   :  { %v734_v57 = vpop.f32.mrb[33].mxu0 }
 0x181   :  { %v872_v59 = vadd.f32 %v3283_v19, %v734_v57  ;;  %2325 = vmatmul.mubr.msk.f32.gmra.mrb[46].mxu1 %vm1003_vm1, %v934_v55 }
 0x182   :  { %1260 = vmatprep.mubr.f32.mxu1 %v2736_v3 }
 0x183   :  { %v936_v60 = vmax.f32 %v872_v59, 0.0  ;;  %v3380_v61 = vpop.f32.mrb[34].mxu0 }
 0x184   :  { %v740_v22 = vpop.f32.mrb[35].mxu0 }
 0x185   :  { %v874_v23 = vadd.f32 %v3283_v19, %v740_v22  ;;  %2326 = vmatmul.mubr.msk.f32.gmra.mrb[48].mxu1 %vm1003_vm1, %v936_v60 }
 0x186   :  { %1266 = vmatprep.mubr.f32.mxu1 %v2736_v3 }
 0x187   :  { %v938_v25 = vmax.f32 %v874_v23, 0.0  ;;  %v3385_v27 = vpop.f32.mrb[36].mxu0 }
 0x188   :  { %v746_v28 = vpop.f32.mrb[37].mxu0 }
 0x189   :  { %v876_v29 = vadd.f32 %v3283_v19, %v746_v28  ;;  %2327 = vmatmul.mubr.msk.f32.gmra.mrb[50].mxu1 %vm1003_vm1, %v938_v25 }
 0x18a   :  { %1272 = vmatprep.mubr.f32.mxu1 %v2736_v3 }
 0x18b   :  { %v940_v31 = vmax.f32 %v876_v29, 0.0  ;;  %v3390_v32 = vpop.f32.mrb[38].mxu0 }
 0x18c   :  { %v752_v33 = vpop.f32.mrb[39].mxu0 }
 0x18d   :  { %v878_v36 = vadd.f32 %v3283_v19, %v752_v33  ;;  %2328 = vmatmul.mubr.msk.f32.gmra.mrb[52].mxu1 %vm1003_vm1, %v940_v31 }
 0x18e   :  { %1278 = vmatprep.mubr.f32.mxu1 %v2736_v3 }
 0x18f   :  { %v942_v37 = vmax.f32 %v878_v36, 0.0  ;;  %v3395_v39 = vpop.f32.mrb[40].mxu0 }
 0x190   :  { %v758_v41 = vpop.f32.mrb[41].mxu0 }
 0x191   :  { %v880_v43 = vadd.f32 %v3283_v19, %v758_v41  ;;  %2329 = vmatmul.mubr.msk.f32.gmra.mrb[54].mxu1 %vm1003_vm1, %v942_v37 }
 0x192   :  { %1284 = vmatprep.mubr.f32.mxu1 %v2736_v3 }
 0x193   :  { %v944_v44 = vmax.f32 %v880_v43, 0.0  ;;  %v3400_v47 = vpop.f32.mrb[42].mxu0 }
 0x194   :  { %v764_v48 = vpop.f32.mrb[43].mxu0 }
 0x195   :  { %v882_v49 = vadd.f32 %v3283_v19, %v764_v48  ;;  %2330 = vmatmul.mubr.msk.f32.gmra.mrb[56].mxu1 %vm1003_vm1, %v944_v44 }
 0x196   :  { %1290 = vmatprep.mubr.f32.mxu1 %v2736_v3 }
 0x197   :  { %v946_v52 = vmax.f32 %v882_v49, 0.0  ;;  %v3405_v53 = vpop.f32.mrb[44].mxu0 }
 0x198   :  { %v770_v55 = vpop.f32.mrb[45].mxu0 }
 0x199   :  { %v884_v57 = vadd.f32 %v3283_v19, %v770_v55  ;;  %2331 = vmatmul.mubr.msk.f32.gmra.mrb[58].mxu1 %vm1003_vm1, %v946_v52 }
 0x19a   :  { %1296 = vmatprep.mubr.f32.mxu1 %v2736_v3 }
 0x19b   :  { %v948_v59 = vmax.f32 %v884_v57, 0.0  ;;  %v3410_v60 = vpop.f32.mrb[46].mxu0 }
 0x19c   :  { %v776_v22 = vpop.f32.mrb[47].mxu0 }
 0x19d   :  { %v886_v23 = vadd.f32 %v3283_v19, %v776_v22  ;;  %2332 = vmatmul.mubr.msk.f32.gmra.mrb[60].mxu1 %vm1003_vm1, %v948_v59  ;;  %v1587_v22 = vld [vmem:[%s4048_s7 + $0x30] sm:$0xff] }
 0x19e   :  { %1302 = vmatprep.mubr.f32.mxu1 %v2736_v3 }
 0x19f   :  { %v950_v25 = vmax.f32 %v886_v23, 0.0  ;;  %v780_v28 = vpop.f32.mrb[48].mxu0  ;;  %v1588_v23 = vld [vmem:[%s4048_s7 + $0x38] sm:$0xff] }
 0x1a0   :  { %v3416_v29 = vadd.f32 %v780_v28, %v3239_v62  ;;  %v782_v31 = vpop.f32.mrb[49].mxu0  ;;  %v1585_v62 = vld [vmem:[%s4048_s7 + $0x20] sm:$0xff] }
 0x1a1   :  { %v783_v33 = vadd.f32 %v782_v31, %v3241_v63  ;;  %2333 = vmatmul.mubr.msk.f32.gmra.mrb[62].mxu1 %vm1003_vm1, %v950_v25  ;;  %v1586_v63 = vld [vmem:[%s4048_s7 + $0x28] sm:$0xff]  ;;  %v2532_v25 = vpack.c.bf16 %v1588_v23, %v1587_v22 }
 0x1a2   :  { %1308 = vmatprep.mubr.f32.mxu1 %v2736_v3  ;;  %v2528_v49 = vpack.c.bf16 %v1586_v63, %v1585_v62 }
 0x1a3   :  { %v888_v36 = vadd.f32 %v3283_v19, %v783_v33  ;;  %v786_v37 = vpop.f32.mrb[50].mxu0 }
 0x1a4   :  { %v3423_v41 = vadd.f32 %v786_v37, %v3243_v0  ;;  %v788_v43 = vpop.f32.mrb[51].mxu0  ;;  %2529 = vmatprep.subr.bf16.mxu1 %v2528_v49 }
 0x1a5   :  { %v952_v44 = vmax.f32 %v888_v36, 0.0  ;;  %v789_v48 = vadd.f32 %v788_v43, %v3245_v1  ;;  %2531 = vmatpush3.bf16.msra.mxu1 %v2528_v49 }
 0x1a6   :  { %2533 = vmatprep.subr.bf16.mxu1 %v2532_v25 }
 0x1a7   :  { %v890_v52 = vadd.f32 %v3283_v19, %v789_v48  ;;  %v792_v55 = vpop.f32.mrb[52].mxu0  ;;  %2334 = vmatmul.mubr.msk.f32.gmra.mrb[64].mxu1 %vm1003_vm1, %v952_v44 }
 0x1a8   :  { %v3435_v0 = vadd.f32 %v792_v55, %v3247_v2  ;;  %v794_v57 = vpop.f32.mrb[53].mxu0  ;;  %1314 = vmatprep.mubr.f32.mxu1 %v2736_v3 }
 0x1a9   :  { %v954_v1 = vmax.f32 %v890_v52, 0.0  ;;  %v795_v59 = vadd.f32 %v794_v57, %v3249_v4  ;;  %2535 = vmatpush3.bf16.msra.mxu1 %v2532_v25 }
 0x1ab   :  { %v892_v2 = vadd.f32 %v3283_v19, %v795_v59  ;;  %v798_v28 = vpop.f32.mrb[54].mxu0  ;;  %2335 = vmatmul.mubr.msk.f32.gmra.mrb[66].mxu1 %vm1003_vm1, %v954_v1 }
 0x1ac   :  { %v3448_v31 = vadd.f32 %v798_v28, %v3251_v5  ;;  %v800_v33 = vpop.f32.mrb[55].mxu0  ;;  %1320 = vmatprep.mubr.f32.mxu1 %v2736_v3 }
 0x1ad   :  { %v956_v4 = vmax.f32 %v892_v2, 0.0  ;;  %v801_v36 = vadd.f32 %v800_v33, %v3253_v6 }
 0x1af   :  { %v894_v37 = vadd.f32 %v3283_v19, %v801_v36  ;;  %v804_v43 = vpop.f32.mrb[56].mxu0  ;;  %2336 = vmatmul.mubr.msk.f32.gmra.mrb[68].mxu1 %vm1003_vm1, %v956_v4  ;;  %v2737_v4 = vmov 0   ;;  %v3499_v36 = vld [vmem:[%s4050_s6] sm:$0x3] }
 0x1b0   :  { %v3455_v44 = vadd.f32 %v804_v43, %v3255_v7  ;;  %v806_v48 = vpop.f32.mrb[57].mxu0  ;;  %1326 = vmatprep.mubr.f32.mxu1 %v2736_v3  ;;  %2606 = vset.pattern.permute.xlu0 %v2737_v4 }
 0x1b1   :  { %v958_v5 = vmax.f32 %v894_v37, 0.0  ;;  %v807_v62 = vadd.f32 %v806_v48, %v3257_v8  ;;  %2607 = vset.pattern.permute.xlu1 %v2737_v4  ;;  %v831_v37 = vsub.s32 0, %v3264_v12 }
 0x1b3   :  { %v896_v63 = vadd.f32 %v3283_v19, %v807_v62  ;;  %v810_v49 = vpop.f32.mrb[58].mxu0  ;;  %2337 = vmatmul.mubr.msk.f32.gmra.mrb[70].mxu1 %vm1003_vm1, %v958_v5  ;;  %v3503_v43 = vrot.slane %v3499_v36, %v831_v37 }
 0x1b4   :  { %v3462_v6 = vadd.f32 %v810_v49, %v3259_v10  ;;  %v812_v52 = vpop.f32.mrb[59].mxu0  ;;  %1332 = vmatprep.mubr.f32.mxu1 %v2736_v3 }
 0x1b5   :  { %v960_v55 = vmax.f32 %v896_v63, 0.0  ;;  %v813_v7 = vadd.f32 %v812_v52, %v3261_v11 }
 0x1b7   :  { %v898_v57 = vadd.f32 %v3283_v19, %v813_v7  ;;  %v816_v1 = vpop.f32.mrb[60].mxu0  ;;  %2338 = vmatmul.mubr.msk.f32.gmra.mrb[72].mxu1 %vm1003_vm1, %v960_v55 }
 0x1b8   :  { %v3469_v8 = vadd.f32 %v816_v1, %v3266_v13  ;;  %v818_v59 = vpop.f32.mrb[61].mxu0  ;;  %1338 = vmatprep.mubr.f32.mxu1 %v2736_v3 }
 0x1b9   :  { %v962_v22 = vmax.f32 %v898_v57, 0.0  ;;  %v819_v10 = vadd.f32 %v818_v59, %v3268_v14  ;;  %v3512_v57 = vrot.slane %v3274_v16, %v831_v37 }
 0x1bb   :  { %v900_v23 = vadd.f32 %v3283_v19, %v819_v10  ;;  %v822_v25 = vpop.f32.mrb[62].mxu0  ;;  %2339 = vmatmul.mubr.msk.f32.gmra.mrb[74].mxu1 %vm1003_vm1, %v962_v22 }
 0x1bc   :  { %v3476_v11 = vadd.f32 %v822_v25, %v3276_v17  ;;  %v824_v2 = vpop.f32.mrb[63].mxu0  ;;  %1344 = vmatprep.mubr.f32.mxu1 %v2736_v3  ;;  %v1982_v17 = vld [vmem:[%s4049_s9] sm:$0xff] }
 0x1bd   :  { %v964_v28 = vmax.f32 %v900_v23, 0.0  ;;  %v825_v13 = vadd.f32 %v824_v2, %v3278_v18  ;;  %1992 = vperm.xlu0 %2606, %v1982_v17   ;;  %v1984_v18 = vld [vmem:[%s4049_s9 + $0x10] sm:$0xff]  ;;  %v839_v23 = vadd.f32 %v3512_v57, %v3285_v20 }
 0x1be   :  { %1998 = vperm.xlu1 %2607, %v1984_v18  }
 0x1bf   :  { %v902_v33 = vadd.f32 %v3283_v19, %v825_v13  ;;  %2340 = vmatmul.mubr.msk.f32.gmra.mrb[76].mxu1 %vm1003_vm1, %v964_v28  ;;  %v1985_v19 = vld [vmem:[%s4049_s9 + $0x18] sm:$0xff]  ;;  %v903_v16 = vmax.f32 %v839_v23, 0.0  ;;  %v845_v23 = vadd.f32 %v3512_v57, %v3310_v38 }
 0x1c0   :  { %1350 = vmatprep.mubr.f32.mxu1 %v2736_v3  ;;  %v1983_v3 = vld [vmem:[%s4049_s9 + $0x8] sm:$0xff] }
 0x1c1   :  { %v966_v14 = vmax.f32 %v902_v33, 0.0  ;;  %1995 = vperm.xlu0 %2606, %v1983_v3  }
 0x1c2   :  { %2001 = vperm.xlu1 %2607, %v1985_v19  }
 0x1c3   :  { %2341 = vmatmul.mubr.msk.f32.gmra.mrb[78].mxu1 %vm1003_vm1, %v966_v14  ;;  %v841_v14 = vadd.f32 %v3512_v57, %v3288_v24 }
 0x218   :  { %v1166_v48 = vpop.f32.mrb[16].mxu1 }
 0x219   :  { %v1167_v5 = vadd.f32 %v1166_v48, %v3503_v43  ;;  %v3506_v62 = vpop.f32.mrb[17].mxu1  ;;  %v905_v48 = vmax.f32 %v841_v14, 0.0 }
 0x21b   :  { %v1357_v63 = vmul.f32 0.5, %v1167_v5  ;;  %v843_v5 = vadd.f32 %v3512_v57, %v3305_v34 }
 0x21c   :  { %v1172_v49 = vpop.f32.mrb[18].mxu1 }
 0x21d   :  { %2608 = vtanh.f32 %v1357_v63  ;;  %v1173_v52 = vadd.f32 %v1172_v49, %v3503_v43  ;;  %v3509_v55 = vpop.f32.mrb[19].mxu1 }
 0x21f   :  { %v1359_v7 = vmul.f32 0.5, %v1173_v52 }
 0x220   :  { %v1178_v1 = vpop.f32.mrb[20].mxu1 }
 0x221   :  { %2610 = vtanh.f32 %v1359_v7  ;;  %v1179_v59 = vadd.f32 %v1178_v1, %v3503_v43  ;;  %v3515_v22 = vpop.f32.mrb[21].mxu1 }
 0x223   :  { %v1361_v10 = vmul.f32 0.5, %v1179_v59 }
 0x224   :  { %v1184_v25 = vpop.f32.mrb[22].mxu1 }
 0x225   :  { %2612 = vtanh.f32 %v1361_v10  ;;  %v1185_v2 = vadd.f32 %v1184_v25, %v3503_v43  ;;  %v3520_v28 = vpop.f32.mrb[23].mxu1  ;;  %v907_v10 = vmax.f32 %v843_v5, 0.0 }
 0x227   :  { %v2609_v13 = vpop.eup %2608  ;;  %v1363_v33 = vmul.f32 0.5, %v1185_v2 }
 0x228   :  { %v1485_v4 = vadd.f32 1.0, %v2609_v13  ;;  %v1190_v17 = vpop.f32.mrb[24].mxu1 }
 0x229   :  { %2614 = vtanh.f32 %v1363_v33  ;;  %v1191_v18 = vadd.f32 %v1190_v17, %v3503_v43  ;;  %v3525_v3 = vpop.f32.mrb[25].mxu1  ;;  %v847_v17 = vadd.f32 %v3512_v57, %v3315_v42 }
 0x22a   :  { %v1549_v20 = vmul.f32 %v1485_v4, %v903_v16  ;;  %v909_v4 = vmax.f32 %v845_v23, 0.0 }
 0x22b   :  { %v2611_v19 = vpop.eup %2610  ;;  %v1365_v37 = vmul.f32 0.5, %v1191_v18 }
 0x22c   :  { %v1487_v63 = vadd.f32 1.0, %v2611_v19  ;;  %v1196_v49 = vpop.f32.mrb[26].mxu1  ;;  %2432 = vmatprep.mubr.msk.f32.mxu1 %vm1596_vm2, %v1549_v20 }
 0x22d   :  { %2616 = vtanh.f32 %v1365_v37  ;;  %v1197_v24 = vadd.f32 %v1196_v49, %v3503_v43  ;;  %v3531_v52 = vpop.f32.mrb[27].mxu1  ;;  %v849_v49 = vadd.f32 %v3512_v57, %v3320_v46 }
 0x22e   :  { %v1550_v7 = vmul.f32 %v1487_v63, %v905_v48  ;;  %v911_v63 = vmax.f32 %v847_v17, 0.0 }
 0x22f   :  { %v2613_v1 = vpop.eup %2612  ;;  %v1367_v59 = vmul.f32 0.5, %v1197_v24 }
 0x230   :  { %v1489_v25 = vadd.f32 1.0, %v2613_v1  ;;  %v1202_v2 = vpop.f32.mrb[28].mxu1  ;;  %2433 = vmatmul.mubr.msk.f32.vlgmr.msra.gmra.mrb[80].mxu1 %vm1596_vm2, %v1550_v7 }
 0x231   :  { %2618 = vtanh.f32 %v1367_v59  ;;  %v1203_v34 = vadd.f32 %v1202_v2, %v3503_v43  ;;  %v3537_v13 = vpop.f32.mrb[29].mxu1  ;;  %v851_v2 = vadd.f32 %v3512_v57, %v3325_v50 }
 0x232   :  { %v1551_v33 = vmul.f32 %v1489_v25, %v907_v10  ;;  %v913_v25 = vmax.f32 %v849_v49, 0.0 }
 0x233   :  { %v2615_v16 = vpop.eup %2614  ;;  %v1369_v14 = vmul.f32 0.5, %v1203_v34 }
 0x234   :  { %v1491_v18 = vadd.f32 1.0, %v2615_v16  ;;  %v1208_v20 = vpop.f32.mrb[30].mxu1  ;;  %2435 = vmatprep.mubr.msk.f32.mxu1 %vm1596_vm2, %v1551_v33 }
 0x235   :  { %2620 = vtanh.f32 %v1369_v14  ;;  %v1209_v38 = vadd.f32 %v1208_v20, %v3503_v43  ;;  %v3543_v19 = vpop.f32.mrb[31].mxu1  ;;  %v853_v20 = vadd.f32 %v3512_v57, %v3330_v54 }
 0x236   :  { %v1552_v37 = vmul.f32 %v1491_v18, %v909_v4  ;;  %v915_v18 = vmax.f32 %v851_v2, 0.0 }
 0x237   :  { %v2617_v48 = vpop.eup %2616  ;;  %v1371_v5 = vmul.f32 0.5, %v1209_v38 }
 0x238   :  { %v1493_v24 = vadd.f32 1.0, %v2617_v48  ;;  %v1214_v7 = vpop.f32.mrb[32].mxu1  ;;  %2436 = vmatmul.mubr.msk.f32.gmra.mrb[82].mxu1 %vm1596_vm2, %v1552_v37 }
 0x239   :  { %2622 = vtanh.f32 %v1371_v5  ;;  %v1215_v42 = vadd.f32 %v1214_v7, %v3503_v43  ;;  %v3549_v1 = vpop.f32.mrb[33].mxu1  ;;  %v855_v7 = vadd.f32 %v3512_v57, %v3335_v58 }
 0x23a   :  { %v1553_v59 = vmul.f32 %v1493_v24, %v911_v63  ;;  %v917_v24 = vmax.f32 %v853_v20, 0.0 }
 0x23b   :  { %v2619_v10 = vpop.eup %2618  ;;  %v1373_v23 = vmul.f32 0.5, %v1215_v42 }
 0x23c   :  { %v1495_v34 = vadd.f32 1.0, %v2619_v10  ;;  %v1220_v33 = vpop.f32.mrb[34].mxu1  ;;  %2438 = vmatprep.mubr.msk.f32.mxu1 %vm1596_vm2, %v1553_v59 }
 0x23d   :  { %2624 = vtanh.f32 %v1373_v23  ;;  %v1221_v46 = vadd.f32 %v1220_v33, %v3503_v43  ;;  %v3555_v16 = vpop.f32.mrb[35].mxu1  ;;  %v857_v33 = vadd.f32 %v3512_v57, %v3340_v21 }
 0x23e   :  { %v1554_v14 = vmul.f32 %v1495_v34, %v913_v25  ;;  %v919_v34 = vmax.f32 %v855_v7, 0.0 }
 0x23f   :  { %v2621_v4 = vpop.eup %2620  ;;  %v1375_v17 = vmul.f32 0.5, %v1221_v46 }
 0x240   :  { %v1497_v38 = vadd.f32 1.0, %v2621_v4  ;;  %v1226_v37 = vpop.f32.mrb[36].mxu1  ;;  %2439 = vmatmul.mubr.msk.f32.gmra.mrb[84].mxu1 %vm1596_vm2, %v1554_v14 }
 0x241   :  { %2626 = vtanh.f32 %v1375_v17  ;;  %v1227_v50 = vadd.f32 %v1226_v37, %v3503_v43  ;;  %v3561_v48 = vpop.f32.mrb[37].mxu1  ;;  %v859_v37 = vadd.f32 %v3512_v57, %v3345_v26 }
 0x242   :  { %v1555_v5 = vmul.f32 %v1497_v38, %v915_v18  ;;  %v921_v38 = vmax.f32 %v857_v33, 0.0 }
 0x243   :  { %v2623_v63 = vpop.eup %2622  ;;  %v1377_v49 = vmul.f32 0.5, %v1227_v50 }
 0x244   :  { %v1499_v42 = vadd.f32 1.0, %v2623_v63  ;;  %v1232_v59 = vpop.f32.mrb[38].mxu1  ;;  %2441 = vmatprep.mubr.msk.f32.mxu1 %vm1596_vm2, %v1555_v5 }
 0x245   :  { %2628 = vtanh.f32 %v1377_v49  ;;  %v1233_v54 = vadd.f32 %v1232_v59, %v3503_v43  ;;  %v3567_v10 = vpop.f32.mrb[39].mxu1  ;;  %v861_v59 = vadd.f32 %v3512_v57, %v3350_v30 }
 0x246   :  { %v1556_v23 = vmul.f32 %v1499_v42, %v917_v24  ;;  %v923_v42 = vmax.f32 %v859_v37, 0.0 }
 0x247   :  { %v2625_v25 = vpop.eup %2624  ;;  %v1379_v2 = vmul.f32 0.5, %v1233_v54 }
 0x248   :  { %v1501_v46 = vadd.f32 1.0, %v2625_v25  ;;  %v1238_v14 = vpop.f32.mrb[40].mxu1  ;;  %2442 = vmatmul.mubr.msk.f32.gmra.mrb[86].mxu1 %vm1596_vm2, %v1556_v23 }
 0x249   :  { %2630 = vtanh.f32 %v1379_v2  ;;  %v1239_v58 = vadd.f32 %v1238_v14, %v3503_v43  ;;  %v3573_v4 = vpop.f32.mrb[41].mxu1  ;;  %v863_v14 = vadd.f32 %v3512_v57, %v3355_v35 }
 0x24a   :  { %v1557_v17 = vmul.f32 %v1501_v46, %v919_v34  ;;  %v925_v46 = vmax.f32 %v861_v59, 0.0 }
 0x24b   :  { %v2627_v18 = vpop.eup %2626  ;;  %v1381_v20 = vmul.f32 0.5, %v1239_v58 }
 0x24c   :  { %v1503_v50 = vadd.f32 1.0, %v2627_v18  ;;  %v1244_v5 = vpop.f32.mrb[42].mxu1  ;;  %2444 = vmatprep.mubr.msk.f32.mxu1 %vm1596_vm2, %v1557_v17 }
 0x24d   :  { %2632 = vtanh.f32 %v1381_v20  ;;  %v1245_v21 = vadd.f32 %v1244_v5, %v3503_v43  ;;  %v3579_v63 = vpop.f32.mrb[43].mxu1  ;;  %v865_v5 = vadd.f32 %v3512_v57, %v3360_v40 }
 0x24e   :  { %v1558_v49 = vmul.f32 %v1503_v50, %v921_v38  ;;  %v927_v50 = vmax.f32 %v863_v14, 0.0 }
 0x24f   :  { %v2629_v24 = vpop.eup %2628  ;;  %v1383_v7 = vmul.f32 0.5, %v1245_v21 }
 0x250   :  { %v1505_v54 = vadd.f32 1.0, %v2629_v24  ;;  %v1250_v23 = vpop.f32.mrb[44].mxu1  ;;  %2445 = vmatmul.mubr.msk.f32.gmra.mrb[88].mxu1 %vm1596_vm2, %v1558_v49 }
 0x251   :  { %2634 = vtanh.f32 %v1383_v7  ;;  %v1251_v26 = vadd.f32 %v1250_v23, %v3503_v43  ;;  %v3585_v25 = vpop.f32.mrb[45].mxu1  ;;  %v867_v23 = vadd.f32 %v3512_v57, %v3365_v45 }
 0x252   :  { %v1559_v2 = vmul.f32 %v1505_v54, %v923_v42  ;;  %v929_v54 = vmax.f32 %v865_v5, 0.0 }
 0x253   :  { %v2631_v34 = vpop.eup %2630  ;;  %v1385_v33 = vmul.f32 0.5, %v1251_v26 }
 0x254   :  { %v1507_v58 = vadd.f32 1.0, %v2631_v34  ;;  %v1256_v17 = vpop.f32.mrb[46].mxu1  ;;  %2447 = vmatprep.mubr.msk.f32.mxu1 %vm1596_vm2, %v1559_v2 }
 0x255   :  { %2636 = vtanh.f32 %v1385_v33  ;;  %v1257_v30 = vadd.f32 %v1256_v17, %v3503_v43  ;;  %v3591_v18 = vpop.f32.mrb[47].mxu1  ;;  %v869_v17 = vadd.f32 %v3512_v57, %v3370_v51 }
 0x256   :  { %v1560_v20 = vmul.f32 %v1507_v58, %v925_v46  ;;  %v931_v58 = vmax.f32 %v867_v23, 0.0 }
 0x257   :  { %v2633_v38 = vpop.eup %2632  ;;  %v1387_v37 = vmul.f32 0.5, %v1257_v30 }
 0x258   :  { %v1509_v21 = vadd.f32 1.0, %v2633_v38  ;;  %v1262_v49 = vpop.f32.mrb[48].mxu1  ;;  %2448 = vmatmul.mubr.msk.f32.gmra.mrb[90].mxu1 %vm1596_vm2, %v1560_v20 }
 0x259   :  { %2638 = vtanh.f32 %v1387_v37  ;;  %v1263_v35 = vadd.f32 %v1262_v49, %v3503_v43  ;;  %v3597_v24 = vpop.f32.mrb[49].mxu1  ;;  %v871_v49 = vadd.f32 %v3512_v57, %v3375_v56 }
 0x25a   :  { %v1561_v7 = vmul.f32 %v1509_v21, %v927_v50  ;;  %v933_v21 = vmax.f32 %v869_v17, 0.0 }
 0x25b   :  { %v2635_v42 = vpop.eup %2634  ;;  %v1389_v59 = vmul.f32 0.5, %v1263_v35 }
 0x25c   :  { %v1511_v26 = vadd.f32 1.0, %v2635_v42  ;;  %v1268_v2 = vpop.f32.mrb[50].mxu1  ;;  %2450 = vmatprep.mubr.msk.f32.mxu1 %vm1596_vm2, %v1561_v7 }
 0x25d   :  { %2640 = vtanh.f32 %v1389_v59  ;;  %v1269_v40 = vadd.f32 %v1268_v2, %v3503_v43  ;;  %v3603_v34 = vpop.f32.mrb[51].mxu1  ;;  %v873_v2 = vadd.f32 %v3512_v57, %v3380_v61 }
 0x25e   :  { %v1562_v33 = vmul.f32 %v1511_v26, %v929_v54  ;;  %v935_v26 = vmax.f32 %v871_v49, 0.0 }
 0x25f   :  { %v2637_v46 = vpop.eup %2636  ;;  %v1391_v14 = vmul.f32 0.5, %v1269_v40 }
 0x260   :  { %v1513_v30 = vadd.f32 1.0, %v2637_v46  ;;  %v1274_v20 = vpop.f32.mrb[52].mxu1  ;;  %2451 = vmatmul.mubr.msk.f32.gmra.mrb[92].mxu1 %vm1596_vm2, %v1562_v33 }
 0x261   :  { %2642 = vtanh.f32 %v1391_v14  ;;  %v1275_v45 = vadd.f32 %v1274_v20, %v3503_v43  ;;  %v3609_v38 = vpop.f32.mrb[53].mxu1  ;;  %v875_v20 = vadd.f32 %v3512_v57, %v3385_v27 }
 0x262   :  { %v1563_v37 = vmul.f32 %v1513_v30, %v931_v58  ;;  %v937_v30 = vmax.f32 %v873_v2, 0.0 }
 0x263   :  { %v2639_v50 = vpop.eup %2638  ;;  %v1393_v5 = vmul.f32 0.5, %v1275_v45 }
 0x264   :  { %v1515_v35 = vadd.f32 1.0, %v2639_v50  ;;  %v1280_v7 = vpop.f32.mrb[54].mxu1  ;;  %2453 = vmatprep.mubr.msk.f32.mxu1 %vm1596_vm2, %v1563_v37 }
 0x265   :  { %2644 = vtanh.f32 %v1393_v5  ;;  %v1281_v51 = vadd.f32 %v1280_v7, %v3503_v43  ;;  %v3615_v42 = vpop.f32.mrb[55].mxu1  ;;  %v877_v7 = vadd.f32 %v3512_v57, %v3390_v32 }
 0x266   :  { %v1564_v59 = vmul.f32 %v1515_v35, %v933_v21  ;;  %v939_v35 = vmax.f32 %v875_v20, 0.0 }
 0x267   :  { %v2641_v54 = vpop.eup %2640  ;;  %v1395_v23 = vmul.f32 0.5, %v1281_v51 }
 0x268   :  { %v1517_v40 = vadd.f32 1.0, %v2641_v54  ;;  %v1286_v33 = vpop.f32.mrb[56].mxu1  ;;  %2454 = vmatmul.mubr.msk.f32.gmra.mrb[94].mxu1 %vm1596_vm2, %v1564_v59 }
 0x269   :  { %2646 = vtanh.f32 %v1395_v23  ;;  %v1287_v56 = vadd.f32 %v1286_v33, %v3503_v43  ;;  %v3621_v46 = vpop.f32.mrb[57].mxu1  ;;  %v879_v33 = vadd.f32 %v3512_v57, %v3395_v39 }
 0x26a   :  { %v1565_v14 = vmul.f32 %v1517_v40, %v935_v26  ;;  %v941_v40 = vmax.f32 %v877_v7, 0.0 }
 0x26b   :  { %v2643_v58 = vpop.eup %2642  ;;  %v1397_v17 = vmul.f32 0.5, %v1287_v56 }
 0x26c   :  { %v1519_v45 = vadd.f32 1.0, %v2643_v58  ;;  %v1292_v37 = vpop.f32.mrb[58].mxu1  ;;  %2456 = vmatprep.mubr.msk.f32.mxu1 %vm1596_vm2, %v1565_v14 }
 0x26d   :  { %2648 = vtanh.f32 %v1397_v17  ;;  %v1293_v61 = vadd.f32 %v1292_v37, %v3503_v43  ;;  %v3627_v50 = vpop.f32.mrb[59].mxu1  ;;  %v881_v37 = vadd.f32 %v3512_v57, %v3400_v47 }
 0x26e   :  { %v1566_v5 = vmul.f32 %v1519_v45, %v937_v30  ;;  %v943_v45 = vmax.f32 %v879_v33, 0.0 }
 0x26f   :  { %v2645_v21 = vpop.eup %2644  ;;  %v1399_v49 = vmul.f32 0.5, %v1293_v61  ;;  %v945_v7 = vmax.f32 %v881_v37, 0.0 }
 0x270   :  { %v1521_v51 = vadd.f32 1.0, %v2645_v21  ;;  %v1298_v59 = vpop.f32.mrb[60].mxu1  ;;  %2457 = vmatmul.mubr.msk.f32.gmra.mrb[96].mxu1 %vm1596_vm2, %v1566_v5 }
 0x271   :  { %2650 = vtanh.f32 %v1399_v49  ;;  %v1299_v27 = vadd.f32 %v1298_v59, %v3503_v43  ;;  %v3633_v54 = vpop.f32.mrb[61].mxu1 }
 0x272   :  { %v1567_v23 = vmul.f32 %v1521_v51, %v939_v35  ;;  %v883_v51 = vadd.f32 %v3512_v57, %v3405_v53 }
 0x273   :  { %v2647_v26 = vpop.eup %2646  ;;  %v1401_v2 = vmul.f32 0.5, %v1299_v27 }
 0x274   :  { %v1523_v56 = vadd.f32 1.0, %v2647_v26  ;;  %v1304_v14 = vpop.f32.mrb[62].mxu1  ;;  %2459 = vmatprep.mubr.msk.f32.mxu1 %vm1596_vm2, %v1567_v23  ;;  %v947_v33 = vmax.f32 %v883_v51, 0.0 }
 0x275   :  { %2652 = vtanh.f32 %v1401_v2  ;;  %v1305_v32 = vadd.f32 %v1304_v14, %v3503_v43  ;;  %v3639_v58 = vpop.f32.mrb[63].mxu1 }
 0x276   :  { %v1568_v17 = vmul.f32 %v1523_v56, %v941_v40  ;;  %v885_v56 = vadd.f32 %v3512_v57, %v3410_v60  ;;  %v887_v60 = vadd.f32 %v3512_v57, %v3416_v29 }
 0x277   :  { %v2649_v30 = vpop.eup %2648  ;;  %v1403_v20 = vmul.f32 0.5, %v1305_v32 }
 0x278   :  { %v1525_v61 = vadd.f32 1.0, %v2649_v30  ;;  %2460 = vmatmul.mubr.msk.f32.gmra.mrb[98].mxu1 %vm1596_vm2, %v1568_v17  ;;  %v949_v37 = vmax.f32 %v885_v56, 0.0 }
 0x279   :  { %2654 = vtanh.f32 %v1403_v20 }
 0x27a   :  { %v1569_v39 = vmul.f32 %v1525_v61, %v943_v45  ;;  %v1310_v5 = vpop.f32.mrb[64].mxu1 }
 0x27b   :  { %v2651_v21 = vpop.eup %2650  ;;  %v1311_v49 = vadd.f32 %v1310_v5, %v3503_v43  ;;  %v3645_v35 = vpop.f32.mrb[65].mxu1 }
 0x27c   :  { %v1527_v59 = vadd.f32 1.0, %v2651_v21  ;;  %2462 = vmatprep.mubr.msk.f32.mxu1 %vm1596_vm2, %v1569_v39 }
 0x27d   :  { %v1405_v27 = vmul.f32 0.5, %v1311_v49 }
 0x27e   :  { %v1570_v47 = vmul.f32 %v1527_v59, %v945_v7  ;;  %v1316_v23 = vpop.f32.mrb[66].mxu1 }
 0x27f   :  { %v2653_v26 = vpop.eup %2652  ;;  %2656 = vtanh.f32 %v1405_v27  ;;  %v1317_v2 = vadd.f32 %v1316_v23, %v3503_v43  ;;  %v3651_v40 = vpop.f32.mrb[67].mxu1  ;;  %v951_v27 = vmax.f32 %v887_v60, 0.0 }
 0x280   :  { %v1529_v14 = vadd.f32 1.0, %v2653_v26  ;;  %2463 = vmatmul.mubr.msk.f32.gmra.mrb[100].mxu1 %vm1596_vm2, %v1570_v47  ;;  %v889_v47 = vadd.f32 %v3512_v57, %v3423_v41 }
 0x281   :  { %v1407_v53 = vmul.f32 0.5, %v1317_v2 }
 0x282   :  { %v1571_v32 = vmul.f32 %v1529_v14, %v947_v33  ;;  %v1322_v17 = vpop.f32.mrb[68].mxu1 }
 0x283   :  { %v2655_v30 = vpop.eup %2654  ;;  %2658 = vtanh.f32 %v1407_v53  ;;  %v1323_v20 = vadd.f32 %v1322_v17, %v3503_v43  ;;  %v3657_v45 = vpop.f32.mrb[69].mxu1  ;;  %v953_v53 = vmax.f32 %v889_v47, 0.0 }
 0x284   :  { %v1531_v61 = vadd.f32 1.0, %v2655_v30  ;;  %2465 = vmatprep.mubr.msk.f32.mxu1 %vm1596_vm2, %v1571_v32  ;;  %v891_v32 = vadd.f32 %v3512_v57, %v3435_v0 }
 0x285   :  { %v1409_v39 = vmul.f32 0.5, %v1323_v20 }
 0x286   :  { %v1572_v5 = vmul.f32 %v1531_v61, %v949_v37  ;;  %v1328_v21 = vpop.f32.mrb[70].mxu1  ;;  %v955_v60 = vmax.f32 %v891_v32, 0.0 }
 0x287   :  { %2660 = vtanh.f32 %v1409_v39  ;;  %v1329_v49 = vadd.f32 %v1328_v21, %v3503_v43  ;;  %v3663_v7 = vpop.f32.mrb[71].mxu1 }
 0x288   :  { %2466 = vmatmul.mubr.msk.f32.gmra.mrb[102].mxu1 %vm1596_vm2, %v1572_v5  ;;  %v893_v5 = vadd.f32 %v3512_v57, %v3448_v31 }
 0x289   :  { %v2657_v51 = vpop.eup %2656  ;;  %v1411_v59 = vmul.f32 0.5, %v1329_v49 }
 0x28a   :  { %v1533_v23 = vadd.f32 1.0, %v2657_v51  ;;  %v1334_v26 = vpop.f32.mrb[72].mxu1 }
 0x28b   :  { %2662 = vtanh.f32 %v1411_v59  ;;  %v1335_v29 = vadd.f32 %v1334_v26, %v3503_v43  ;;  %v3669_v2 = vpop.f32.mrb[73].mxu1  ;;  %v895_v26 = vadd.f32 %v3512_v57, %v3455_v44 }
 0x28c   :  { %v1573_v33 = vmul.f32 %v1533_v23, %v951_v27  ;;  %v957_v23 = vmax.f32 %v893_v5, 0.0 }
 0x28d   :  { %v2659_v56 = vpop.eup %2658  ;;  %v1413_v14 = vmul.f32 0.5, %v1335_v29 }
 0x28e   :  { %v1535_v17 = vadd.f32 1.0, %v2659_v56  ;;  %v1340_v30 = vpop.f32.mrb[74].mxu1  ;;  %2468 = vmatprep.mubr.msk.f32.mxu1 %vm1596_vm2, %v1573_v33 }
 0x28f   :  { %2664 = vtanh.f32 %v1413_v14  ;;  %v1341_v41 = vadd.f32 %v1340_v30, %v3503_v43  ;;  %v3675_v20 = vpop.f32.mrb[75].mxu1  ;;  %v897_v30 = vadd.f32 %v3512_v57, %v3462_v6 }
 0x290   :  { %v1574_v37 = vmul.f32 %v1535_v17, %v953_v53  ;;  %v959_v17 = vmax.f32 %v895_v26, 0.0 }
 0x291   :  { %v2661_v61 = vpop.eup %2660  ;;  %v1415_v39 = vmul.f32 0.5, %v1341_v41 }
 0x292   :  { %v1537_v21 = vadd.f32 1.0, %v2661_v61  ;;  %v1346_v49 = vpop.f32.mrb[76].mxu1  ;;  %2469 = vmatmul.mubr.msk.f32.gmra.mrb[104].mxu1 %vm1596_vm2, %v1574_v37  ;;  %v961_v61 = vmax.f32 %v897_v30, 0.0 }
 0x293   :  { %2666 = vtanh.f32 %v1415_v39  ;;  %v1347_v0 = vadd.f32 %v1346_v49, %v3503_v43  ;;  %v3681_v51 = vpop.f32.mrb[77].mxu1  ;;  %v899_v39 = vadd.f32 %v3512_v57, %v3469_v8  ;;  %v901_v49 = vadd.f32 %v3512_v57, %v3476_v11 }
 0x294   :  { %v1575_v59 = vmul.f32 %v1537_v21, %v955_v60  ;;  %v3703_v8 = vrot.slane %v3499_v36, %v835_v15  ;;  %v2004_v57 = vand.u32 127, %v829_v9 }
 0x295   :  { %v2663_v27 = vpop.eup %2662  ;;  %v1417_v47 = vmul.f32 0.5, %v1347_v0  ;;  %v963_v21 = vmax.f32 %v899_v39, 0.0 }
 0x296   :  { %v1539_v29 = vadd.f32 1.0, %v2663_v27  ;;  %v1352_v33 = vpop.f32.mrb[78].mxu1  ;;  %2471 = vmatprep.mubr.msk.f32.mxu1 %vm1596_vm2, %v1575_v59  ;;  %v965_v27 = vmax.f32 %v901_v49, 0.0  ;;  %v1175_v11 = vadd.f32 %v3509_v55, %v3703_v8  ;;  %v1169_v26 = vadd.f32 %v3506_v62, %v3703_v8  ;;  %v1999_v55 = vpop.permute.xlu1 %1998 }
 0x297   :  { %2668 = vtanh.f32 %v1417_v47  ;;  %v1353_v31 = vadd.f32 %v1352_v33, %v3503_v43  ;;  %v3687_v56 = vpop.f32.mrb[79].mxu1  ;;  %v2007_v15 = vsub.s32 %v2004_v57, %v3264_v12  ;;  %v1181_v9 = vadd.f32 %v3515_v22, %v3703_v8  ;;  %v3723_v22 = vld [vmem:[%s4051_s8] ss:$0 sm:$0xff] }
 0x298   :  { %v1576_v14 = vmul.f32 %v1539_v29, %v957_v23  ;;  %v1993_v29 = vpop.permute.xlu0 %1992  ;;  %v1360_v33 = vmul.f32 0.5, %v1175_v11  ;;  %v2023_v62 = vadd.s32 4294967272, %v2004_v57 }
 0x299   :  { %v2665_v53 = vpop.eup %2664  ;;  %v1419_v32 = vmul.f32 0.5, %v1353_v31  ;;  %v2009_v31 = vadd.s32 4294967288, %v2004_v57 }
 0x29a   :  { %v1541_v41 = vadd.f32 1.0, %v2665_v53  ;;  %2472 = vmatmul.mubr.msk.f32.gmra.mrb[106].mxu1 %vm1596_vm2, %v1576_v14  ;;  %v1358_v14 = vmul.f32 0.5, %v1169_v26  ;;  %v2016_v53 = vadd.s32 4294967280, %v2004_v57 }
 0x29b   :  { %2670 = vtanh.f32 %v1419_v32  ;;  %v1187_v32 = vadd.f32 %v3520_v28, %v3703_v8  ;;  %v2012_v36 = vsub.s32 %v2009_v31, %v3264_v12  ;;  %v2026_v28 = vsub.s32 %v2023_v62, %v3264_v12 }
 0x29c   :  { %v1577_v44 = vmul.f32 %v1541_v41, %v959_v17  ;;  %2672 = vtanh.f32 %v1360_v33  ;;  %v1996_v17 = vpop.permute.xlu0 %1995  ;;  %v2019_v30 = vsub.s32 %v2016_v53, %v3264_v12 }
 0x29d   :  { %v2667_v37 = vpop.eup %2666  ;;  %2674 = vtanh.f32 %v1358_v14  ;;  %v1364_v41 = vmul.f32 0.5, %v1187_v32  ;;  %v1211_v14 = vadd.f32 %v3543_v19, %v3703_v8  ;;  %v16_v32 = vstv %s4052_s10 }
 0x29e   :  { %v1543_v43 = vadd.f32 1.0, %v2667_v37  ;;  %2474 = vmatprep.mubr.msk.f32.mxu1 %vm1596_vm2, %v1577_v44  ;;  %v2008_v44 = vrot.slane %v1993_v29, %v2007_v15  ;;  %v2013_v37 = vrot.slane %v1996_v17, %v2012_v36  ;;  %v2020_v39 = vrot.slane %v1999_v55, %v2019_v30  ;;  %17 = vst [vmem:[#allocation2] sm:$0x1] %v16_v32 }
 0x29f   :  { %2676 = vtanh.f32 %v1364_v41  ;;  %v1205_v15 = vadd.f32 %v3537_v13, %v3703_v8  ;;  %v1235_v32 = vadd.f32 %v3567_v10, %v3703_v8 }
 0x2a0   :  { %v1578_v60 = vmul.f32 %v1543_v43, %v961_v61  ;;  %v1362_v61 = vmul.f32 0.5, %v1181_v9  ;;  %v2002_v43 = vpop.permute.xlu1 %2001 }
 0x2a1   :  { %v2669_v5 = vpop.eup %2668  ;;  %v2027_v12 = vrot.slane %v2002_v43, %v2026_v28  ;;  %v1370_v28 = vmul.f32 0.5, %v1205_v15 }
 0x2a2   :  { %v1545_v6 = vadd.f32 1.0, %v2669_v5  ;;  %2475 = vmatmul.mubr.msk.f32.gmra.mrb[108].mxu1 %vm1596_vm2, %v1578_v60  ;;  %v1199_v60 = vadd.f32 %v3531_v52, %v3703_v8  ;;  %v2015_v5 = vsel %vm2014_vm3, %v2013_v37, %v2008_v44  ;;  %2678 = vtanh.f32 %v1362_v61 }
 0x2a3   :  { %v1372_v44 = vmul.f32 0.5, %v1211_v14 }
 0x2a4   :  { %v1579_v0 = vmul.f32 %v1545_v6, %v963_v21  ;;  %v1193_v21 = vadd.f32 %v3525_v3, %v3703_v8  ;;  %v1368_v52 = vmul.f32 0.5, %v1199_v60 }
 0x2a5   :  { %v2671_v59 = vpop.eup %2670 }
 0x2a6   :  { %v1547_v47 = vadd.f32 1.0, %v2671_v59  ;;  %2477 = vmatprep.mubr.msk.f32.mxu1 %vm1596_vm2, %v1579_v0  ;;  %v2673_v49 = vpop.eup %2672  ;;  %v1366_v57 = vmul.f32 0.5, %v1193_v21  ;;  %2680 = vtanh.f32 %v1368_v52  ;;  %v1223_v21 = vadd.f32 %v3555_v16, %v3703_v8 }
 0x2a7   :  { %v2675_v0 = vpop.eup %2674  ;;  %v1488_v11 = vadd.f32 1.0, %v2673_v49 }
 0x2a8   :  { %v1580_v23 = vmul.f32 %v1547_v47, %v965_v27  ;;  %v2022_v27 = vsel %vm2021_vm4, %v2020_v39, %v2015_v5  ;;  %v1486_v29 = vadd.f32 1.0, %v2675_v0  ;;  %2682 = vtanh.f32 %v1366_v57 }
 0x2a9   :  { %v3729_v31 = vsel %vm2028_vm5, %v2027_v12, %v2022_v27  ;;  %v2677_v9 = vpop.eup %2676  ;;  %2684 = vtanh.f32 %v1372_v44  ;;  %v1376_v57 = vmul.f32 0.5, %v1223_v21 }
 0x2aa   :  { %2478 = vmatmul.mubr.msk.f32.gmra.mrb[110].mxu1 %vm1596_vm2, %v1580_v23  ;;  %v1492_v13 = vadd.f32 1.0, %v2677_v9  ;;  %2686 = vtanh.f32 %v1370_v28 }
 0x2ab   :  { %2688 = vtanh.f32 %v1376_v57 }
 0x2ac   :  { %v2679_v62 = vpop.eup %2678 }
 0x2ad   :  { %v1490_v43 = vadd.f32 1.0, %v2679_v62 }
 0x2b0   :  { %v2681_v0 = vpop.eup %2680 }
 0x2b2   :  { %v2683_v27 = vpop.eup %2682 }
 0x303   :  { %v2434_v6 = vpop.f32.mrb[80].mxu1 }
 0x304   :  { %v1765_v59 = vadd.f32 %v2434_v6, %v3723_v22  ;;  %v1759_v47 = vpop.f32.mrb[81].mxu1  ;;  %v1217_v6 = vadd.f32 %v3549_v1, %v3703_v8  ;;  %v1494_v1 = vadd.f32 1.0, %v2683_v27 }
 0x305   :  { %v1760_v23 = vadd.f32 %v3723_v22, %v1759_v47 }
 0x306   :  { %v1919_v26 = vmax.f32 %v1765_v59, 0.0 }
 0x307   :  { %v1918_v33 = vmax.f32 %v1760_v23, 0.0 }
 0x308   :  { %v1951_v3 = vmul.f32 %v1919_v26, %v1488_v11  ;;  %v1496_v26 = vadd.f32 1.0, %v2681_v0 }
 0x309   :  { %v1950_v53 = vmul.f32 %v1918_v33, %v1486_v29  ;;  %v1374_v29 = vmul.f32 0.5, %v1217_v6 }
 0x30a   :  { %v2044_v36 = vmul.f32 %v3729_v31, %v1951_v3 }
 0x30b   :  { %v2437_v55 = vpop.f32.mrb[82].mxu1  ;;  %v2043_v17 = vmul.f32 %v3729_v31, %v1950_v53  ;;  %2690 = vtanh.f32 %v1374_v29 }
 0x30c   :  { %v1775_v30 = vadd.f32 %v2437_v55, %v3723_v22  ;;  %v1769_v19 = vpop.f32.mrb[83].mxu1  ;;  %v2078_v41 = vsel %vm120_vm0, %v2044_v36, 0.0  ;;  %v1229_v36 = vadd.f32 %v3561_v48, %v3703_v8  ;;  %v2685_v55 = vpop.eup %2684 }
 0x30d   :  { %v1770_v37 = vadd.f32 %v3723_v22, %v1769_v19  ;;  %2079 = vadd.xlane.f32.xlu1 %v2078_v41  ;;  %v2075_v61 = vsel %vm120_vm0, %v2043_v17, 0.0 }
 0x30e   :  { %v1921_v39 = vmax.f32 %v1775_v30, 0.0  ;;  %2076 = vadd.xlane.f32.xlu0 %v2075_v61  ;;  %v2687_v30 = vpop.eup %2686  ;;  %v1378_v48 = vmul.f32 0.5, %v1229_v36 }
 0x30f   :  { %v1920_v60 = vmax.f32 %v1770_v37, 0.0  ;;  %v1380_v37 = vmul.f32 0.5, %v1235_v32 }
 0x310   :  { %v1953_v5 = vmul.f32 %v1921_v39, %v1492_v13  ;;  %v1500_v13 = vadd.f32 1.0, %v2685_v55  ;;  %v1498_v39 = vadd.f32 1.0, %v2687_v30 }
 0x311   :  { %v1952_v49 = vmul.f32 %v1920_v60, %v1490_v43  ;;  %2692 = vtanh.f32 %v1380_v37 }
 0x312   :  { %v2046_v12 = vmul.f32 %v3729_v31, %v1953_v5  ;;  %v1247_v5 = vadd.f32 %v3579_v63, %v3703_v8  ;;  %2694 = vtanh.f32 %v1378_v48  ;;  %v1271_v48 = vadd.f32 %v3603_v34, %v3703_v8 }
 0x313   :  { %v2440_v59 = vpop.f32.mrb[84].mxu1  ;;  %v2045_v11 = vmul.f32 %v3729_v31, %v1952_v49  ;;  %v1241_v49 = vadd.f32 %v3573_v4, %v3703_v8 }
 0x314   :  { %v1785_v47 = vadd.f32 %v2440_v59, %v3723_v22  ;;  %v1779_v52 = vpop.f32.mrb[85].mxu1  ;;  %v2084_v23 = vsel %vm120_vm0, %v2046_v12, 0.0  ;;  %v2689_v12 = vpop.eup %2688 }
 0x315   :  { %v1780_v16 = vadd.f32 %v3723_v22, %v1779_v52  ;;  %2085 = vadd.xlane.f32.xlu0 %v2084_v23  ;;  %v2081_v53 = vsel %vm120_vm0, %v2045_v11, 0.0  ;;  %v2691_v27 = vpop.eup %2690  ;;  %v1384_v11 = vmul.f32 0.5, %v1247_v5  ;;  %v1382_v4 = vmul.f32 0.5, %v1241_v49 }
 0x316   :  { %v1923_v33 = vmax.f32 %v1785_v47, 0.0  ;;  %v1502_v29 = vadd.f32 1.0, %v2691_v27 }
 0x317   :  { %v1922_v3 = vmax.f32 %v1780_v16, 0.0  ;;  %v1504_v16 = vadd.f32 1.0, %v2689_v12  ;;  %2696 = vtanh.f32 %v1384_v11 }
 0x318   :  { %v1955_v14 = vmul.f32 %v1923_v33, %v1496_v26  ;;  %2698 = vtanh.f32 %v1382_v4  ;;  %v1277_v4 = vadd.f32 %v3609_v38, %v3703_v8 }
 0x319   :  { %v1954_v15 = vmul.f32 %v1922_v3, %v1494_v1  ;;  %2082 = vadd.xlane.f32.xlu0 %v2081_v53  ;;  %v1259_v3 = vadd.f32 %v3591_v18, %v3703_v8  ;;  %v1253_v53 = vadd.f32 %v3585_v25, %v3703_v8 }
 0x31a   :  { %v2048_v9 = vmul.f32 %v3729_v31, %v1955_v14  ;;  %v1394_v38 = vmul.f32 0.5, %v1277_v4 }
 0x31b   :  { %v2443_v17 = vpop.f32.mrb[86].mxu1  ;;  %v2047_v62 = vmul.f32 %v3729_v31, %v1954_v15  ;;  %v2693_v15 = vpop.eup %2692  ;;  %v1386_v25 = vmul.f32 0.5, %v1253_v53 }
 0x31c   :  { %v1795_v19 = vadd.f32 %v2443_v17, %v3723_v22  ;;  %v1789_v41 = vpop.f32.mrb[87].mxu1  ;;  %v2090_v44 = vsel %vm120_vm0, %v2048_v9, 0.0  ;;  %v2695_v55 = vpop.eup %2694 }
 0x31d   :  { %v1790_v10 = vadd.f32 %v3723_v22, %v1789_v41  ;;  %2091 = vadd.xlane.f32.xlu0 %v2090_v44  ;;  %v2087_v61 = vsel %vm120_vm0, %v2047_v62, 0.0  ;;  %v1508_v44 = vadd.f32 1.0, %v2693_v15 }
 0x31e   :  { %v1925_v28 = vmax.f32 %v1795_v19, 0.0  ;;  %2088 = vadd.xlane.f32.xlu1 %v2087_v61  ;;  %v1388_v19 = vmul.f32 0.5, %v1259_v3 }
 0x31f   :  { %v1924_v43 = vmax.f32 %v1790_v10, 0.0  ;;  %v1506_v10 = vadd.f32 1.0, %v2695_v55 }
 0x320   :  { %v1957_v60 = vmul.f32 %v1925_v28, %v1500_v13  ;;  %2700 = vtanh.f32 %v1388_v19  ;;  %v1295_v19 = vadd.f32 %v3627_v50, %v3703_v8 }
 0x321   :  { %v1956_v21 = vmul.f32 %v1924_v43, %v1498_v39  ;;  %2702 = vtanh.f32 %v1386_v25  ;;  %v1265_v39 = vadd.f32 %v3597_v24, %v3703_v8 }
 0x322   :  { %v2050_v6 = vmul.f32 %v3729_v31, %v1957_v60  ;;  %v2697_v60 = vpop.eup %2696 }
 0x323   :  { %v2446_v0 = vpop.f32.mrb[88].mxu1  ;;  %v2049_v59 = vmul.f32 %v3729_v31, %v1956_v21  ;;  %v2699_v49 = vpop.eup %2698  ;;  %v1390_v24 = vmul.f32 0.5, %v1265_v39  ;;  %v1400_v39 = vmul.f32 0.5, %v1295_v19 }
 0x324   :  { %v1805_v47 = vadd.f32 %v2446_v0, %v3723_v22  ;;  %v1799_v52 = vpop.f32.mrb[89].mxu1  ;;  %v2096_v23 = vsel %vm120_vm0, %v2050_v6, 0.0 }
 0x325   :  { %v1800_v63 = vadd.f32 %v3723_v22, %v1799_v52  ;;  %2097 = vadd.xlane.f32.xlu0 %v2096_v23  ;;  %v2093_v57 = vsel %vm120_vm0, %v2049_v59, 0.0  ;;  %v1392_v59 = vmul.f32 0.5, %v1271_v48  ;;  %v1510_v23 = vadd.f32 1.0, %v2699_v49 }
 0x326   :  { %v1927_v26 = vmax.f32 %v1805_v47, 0.0  ;;  %2094 = vadd.xlane.f32.xlu1 %v2093_v57  ;;  %v1512_v47 = vadd.f32 1.0, %v2697_v60  ;;  %v1283_v57 = vadd.f32 %v3615_v42, %v3703_v8 }
 0x327   :  { %v1926_v33 = vmax.f32 %v1800_v63, 0.0  ;;  %2704 = vtanh.f32 %v1392_v59  ;;  %v1301_v59 = vadd.f32 %v3633_v54, %v3703_v8 }
 0x328   :  { %v1959_v1 = vmul.f32 %v1927_v26, %v1504_v16  ;;  %2706 = vtanh.f32 %v1390_v24  ;;  %v1396_v15 = vmul.f32 0.5, %v1283_v57 }
 0x329   :  { %v1958_v14 = vmul.f32 %v1926_v33, %v1502_v29  ;;  %v1402_v54 = vmul.f32 0.5, %v1301_v59 }
 0x32a   :  { %v2052_v32 = vmul.f32 %v3729_v31, %v1959_v1  ;;  %v2701_v29 = vpop.eup %2700  ;;  %2708 = vtanh.f32 %v1396_v15 }
 0x32b   :  { %v2449_v36 = vpop.f32.mrb[90].mxu1  ;;  %v2051_v9 = vmul.f32 %v3729_v31, %v1958_v14  ;;  %v2703_v3 = vpop.eup %2702  ;;  %2710 = vtanh.f32 %v1394_v38 }
 0x32c   :  { %v1815_v17 = vadd.f32 %v2449_v36, %v3723_v22  ;;  %v1809_v62 = vpop.f32.mrb[91].mxu1  ;;  %v2102_v30 = vsel %vm120_vm0, %v2052_v32, 0.0  ;;  %2712 = vtanh.f32 %v1400_v39 }
 0x32d   :  { %v1810_v18 = vadd.f32 %v3723_v22, %v1809_v62  ;;  %2103 = vadd.xlane.f32.xlu0 %v2102_v30  ;;  %v2099_v41 = vsel %vm120_vm0, %v2051_v9, 0.0  ;;  %v1516_v9 = vadd.f32 1.0, %v2701_v29 }
 0x32e   :  { %v1929_v37 = vmax.f32 %v1815_v17, 0.0  ;;  %2100 = vadd.xlane.f32.xlu1 %v2099_v41  ;;  %v1514_v17 = vadd.f32 1.0, %v2703_v3  ;;  %v1289_v41 = vadd.f32 %v3621_v46, %v3703_v8 }
 0x32f   :  { %v1928_v61 = vmax.f32 %v1810_v18, 0.0 }
 0x330   :  { %v1961_v13 = vmul.f32 %v1929_v37, %v1508_v44  ;;  %v1398_v46 = vmul.f32 0.5, %v1289_v41 }
 0x331   :  { %v1960_v28 = vmul.f32 %v1928_v61, %v1506_v10  ;;  %v2705_v25 = vpop.eup %2704 }
 0x332   :  { %v2054_v43 = vmul.f32 %v3729_v31, %v1961_v13  ;;  %v2707_v61 = vpop.eup %2706  ;;  %v1520_v60 = vadd.f32 1.0, %v2705_v25  ;;  %2714 = vtanh.f32 %v1398_v46 }
 0x333   :  { %v2452_v5 = vpop.f32.mrb[92].mxu1  ;;  %v2053_v21 = vmul.f32 %v3729_v31, %v1960_v28 }
 0x334   :  { %v1825_v6 = vadd.f32 %v2452_v5, %v3723_v22  ;;  %v1819_v12 = vpop.f32.mrb[93].mxu1  ;;  %v2108_v0 = vsel %vm120_vm0, %v2054_v43, 0.0 }
 0x335   :  { %v1820_v34 = vadd.f32 %v3723_v22, %v1819_v12  ;;  %2109 = vadd.xlane.f32.xlu0 %v2108_v0  ;;  %v2105_v27 = vsel %vm120_vm0, %v2053_v21, 0.0  ;;  %v1518_v21 = vadd.f32 1.0, %v2707_v61  ;;  %v1307_v12 = vadd.f32 %v3639_v58, %v3703_v8 }
 0x336   :  { %v1931_v52 = vmax.f32 %v1825_v6, 0.0  ;;  %2106 = vadd.xlane.f32.xlu1 %v2105_v27  ;;  %v2709_v27 = vpop.eup %2708 }
 0x337   :  { %v1930_v11 = vmax.f32 %v1820_v34, 0.0  ;;  %v1404_v57 = vmul.f32 0.5, %v1307_v12  ;;  %v1524_v4 = vadd.f32 1.0, %v2709_v27 }
 0x338   :  { %v1963_v63 = vmul.f32 %v1931_v52, %v1512_v47  ;;  %v2711_v52 = vpop.eup %2710 }
 0x339   :  { %v1962_v16 = vmul.f32 %v1930_v11, %v1510_v23  ;;  %v1522_v29 = vadd.f32 1.0, %v2711_v52  ;;  %2716 = vtanh.f32 %v1404_v57  ;;  %v1337_v52 = vadd.f32 %v3669_v2, %v3703_v8 }
 0x33a   :  { %v2056_v26 = vmul.f32 %v3729_v31, %v1963_v63  ;;  %2718 = vtanh.f32 %v1402_v54 }
 0x33b   :  { %v2455_v33 = vpop.f32.mrb[94].mxu1  ;;  %v2055_v1 = vmul.f32 %v3729_v31, %v1962_v16 }
 0x33c   :  { %v1835_v14 = vadd.f32 %v2455_v33, %v3723_v22  ;;  %v1829_v53 = vpop.f32.mrb[95].mxu1  ;;  %v2114_v32 = vsel %vm120_vm0, %v2056_v26, 0.0 }
 0x33d   :  { %v1830_v42 = vadd.f32 %v3723_v22, %v1829_v53  ;;  %2115 = vadd.xlane.f32.xlu0 %v2114_v32  ;;  %v2111_v36 = vsel %vm120_vm0, %v2055_v1, 0.0  ;;  %v2713_v53 = vpop.eup %2712  ;;  %v1319_v32 = vadd.f32 %v3651_v40, %v3703_v8 }
 0x33e   :  { %v1933_v55 = vmax.f32 %v1835_v14, 0.0  ;;  %2112 = vadd.xlane.f32.xlu1 %v2111_v36  ;;  %v2715_v36 = vpop.eup %2714  ;;  %v1528_v19 = vadd.f32 1.0, %v2713_v53 }
 0x33f   :  { %v1932_v62 = vmax.f32 %v1830_v42, 0.0  ;;  %v1526_v40 = vadd.f32 1.0, %v2715_v36  ;;  %v1408_v41 = vmul.f32 0.5, %v1319_v32  ;;  %v1349_v32 = vadd.f32 %v3681_v51, %v3703_v8 }
 0x340   :  { %v1965_v30 = vmul.f32 %v1933_v55, %v1516_v9  ;;  %v1313_v9 = vadd.f32 %v3645_v35, %v3703_v8 }
 0x341   :  { %v1964_v18 = vmul.f32 %v1932_v62, %v1514_v17  ;;  %2720 = vtanh.f32 %v1408_v41  ;;  %v1418_v51 = vmul.f32 0.5, %v1349_v32 }
 0x342   :  { %v2058_v44 = vmul.f32 %v3729_v31, %v1965_v30  ;;  %v1406_v25 = vmul.f32 0.5, %v1313_v9 }
 0x343   :  { %v2458_v37 = vpop.f32.mrb[96].mxu1  ;;  %v2057_v10 = vmul.f32 %v3729_v31, %v1964_v18  ;;  %v2717_v61 = vpop.eup %2716 }
 0x344   :  { %v1845_v13 = vadd.f32 %v2458_v37, %v3723_v22  ;;  %v1839_v48 = vpop.f32.mrb[97].mxu1  ;;  %v2120_v28 = vsel %vm120_vm0, %v2058_v44, 0.0  ;;  %v2719_v39 = vpop.eup %2718  ;;  %2722 = vtanh.f32 %v1406_v25 }
 0x345   :  { %v1840_v50 = vadd.f32 %v3723_v22, %v1839_v48  ;;  %2121 = vadd.xlane.f32.xlu0 %v2120_v28  ;;  %v2117_v43 = vsel %vm120_vm0, %v2057_v10, 0.0 }
 0x346   :  { %v1935_v5 = vmax.f32 %v1845_v13, 0.0  ;;  %2118 = vadd.xlane.f32.xlu1 %v2117_v43  ;;  %v1331_v13 = vadd.f32 %v3663_v7, %v3703_v8 }
 0x347   :  { %v1934_v49 = vmax.f32 %v1840_v50, 0.0  ;;  %v1325_v50 = vadd.f32 %v3657_v45, %v3703_v8 }
 0x348   :  { %v1967_v6 = vmul.f32 %v1935_v5, %v1520_v60  ;;  %v1412_v12 = vmul.f32 0.5, %v1331_v13 }
 0x349   :  { %v1966_v0 = vmul.f32 %v1934_v49, %v1518_v21  ;;  %v1532_v49 = vadd.f32 1.0, %v2717_v61  ;;  %v1410_v59 = vmul.f32 0.5, %v1325_v50 }
 0x34a   :  { %v2060_v34 = vmul.f32 %v3729_v31, %v1967_v6  ;;  %v1530_v6 = vadd.f32 1.0, %v2719_v39  ;;  %2724 = vtanh.f32 %v1412_v12 }
 0x34b   :  { %v2461_v47 = vpop.f32.mrb[98].mxu1  ;;  %v2059_v24 = vmul.f32 %v3729_v31, %v1966_v0  ;;  %2726 = vtanh.f32 %v1410_v59 }
 0x34c   :  { %v1855_v23 = vadd.f32 %v2461_v47, %v3723_v22  ;;  %v1849_v11 = vpop.f32.mrb[99].mxu1  ;;  %v2126_v63 = vsel %vm120_vm0, %v2060_v34, 0.0  ;;  %v1343_v47 = vadd.f32 %v3675_v20, %v3703_v8 }
 0x34d   :  { %v1850_v58 = vadd.f32 %v3723_v22, %v1849_v11  ;;  %2127 = vadd.xlane.f32.xlu0 %v2126_v63  ;;  %v2123_v16 = vsel %vm120_vm0, %v2059_v24, 0.0  ;;  %v2721_v11 = vpop.eup %2720 }
 0x34e   :  { %v1937_v26 = vmax.f32 %v1855_v23, 0.0  ;;  %2124 = vadd.xlane.f32.xlu1 %v2123_v16  ;;  %v1416_v54 = vmul.f32 0.5, %v1343_v47 }
 0x34f   :  { %v1936_v33 = vmax.f32 %v1850_v58, 0.0  ;;  %v2723_v58 = vpop.eup %2722 }
 0x350   :  { %v1969_v1 = vmul.f32 %v1937_v26, %v1524_v4  ;;  %v1536_v26 = vadd.f32 1.0, %v2721_v11  ;;  %2728 = vtanh.f32 %v1416_v54 }
 0x351   :  { %v1968_v3 = vmul.f32 %v1936_v33, %v1522_v29  ;;  %v1414_v29 = vmul.f32 0.5, %v1337_v52 }
 0x352   :  { %v2062_v14 = vmul.f32 %v3729_v31, %v1969_v1  ;;  %v1534_v1 = vadd.f32 1.0, %v2723_v58 }
 0x353   :  { %v2464_v15 = vpop.f32.mrb[100].mxu1  ;;  %v2061_v42 = vmul.f32 %v3729_v31, %v1968_v3  ;;  %2730 = vtanh.f32 %v1414_v29 }
 0x354   :  { %v1865_v38 = vadd.f32 %v2464_v15, %v3723_v22  ;;  %v1859_v55 = vpop.f32.mrb[101].mxu1  ;;  %v2132_v17 = vsel %vm120_vm0, %v2062_v14, 0.0  ;;  %v1355_v14 = vadd.f32 %v3687_v56, %v3703_v8 }
 0x355   :  { %v1860_v62 = vadd.f32 %v3723_v22, %v1859_v55  ;;  %2133 = vadd.xlane.f32.xlu0 %v2132_v17  ;;  %v2129_v30 = vsel %vm120_vm0, %v2061_v42, 0.0  ;;  %v2725_v42 = vpop.eup %2724 }
 0x356   :  { %v1939_v18 = vmax.f32 %v1865_v38, 0.0  ;;  %2130 = vadd.xlane.f32.xlu1 %v2129_v30  ;;  %v2727_v38 = vpop.eup %2726  ;;  %v1420_v30 = vmul.f32 0.5, %v1355_v14 }
 0x357   :  { %v1938_v44 = vmax.f32 %v1860_v62, 0.0 }
 0x358   :  { %v1971_v37 = vmul.f32 %v1939_v18, %v1528_v19  ;;  %v1540_v18 = vadd.f32 1.0, %v2725_v42  ;;  %2732 = vtanh.f32 %v1420_v30 }
 0x359   :  { %v1970_v10 = vmul.f32 %v1938_v44, %v1526_v40  ;;  %v1538_v40 = vadd.f32 1.0, %v2727_v38  ;;  %2734 = vtanh.f32 %v1418_v51 }
 0x35a   :  { %v2064_v35 = vmul.f32 %v3729_v31, %v1971_v37 }
 0x35b   :  { %v2467_v48 = vpop.f32.mrb[102].mxu1  ;;  %v2063_v28 = vmul.f32 %v3729_v31, %v1970_v10  ;;  %v2729_v10 = vpop.eup %2728 }
 0x35c   :  { %v1875_v43 = vadd.f32 %v2467_v48, %v3723_v22  ;;  %v1869_v60 = vpop.f32.mrb[103].mxu1  ;;  %v2138_v46 = vsel %vm120_vm0, %v2064_v35, 0.0 }
 0x35d   :  { %v1870_v5 = vadd.f32 %v3723_v22, %v1869_v60  ;;  %2139 = vadd.xlane.f32.xlu0 %v2138_v46  ;;  %v2135_v21 = vsel %vm120_vm0, %v2063_v28, 0.0  ;;  %v2731_v13 = vpop.eup %2730  ;;  %v1544_v60 = vadd.f32 1.0, %v2729_v10 }
 0x35e   :  { %v1941_v7 = vmax.f32 %v1875_v43, 0.0  ;;  %2136 = vadd.xlane.f32.xlu1 %v2135_v21 }
 0x35f   :  { %v1940_v0 = vmax.f32 %v1870_v5, 0.0  ;;  %v1542_v5 = vadd.f32 1.0, %v2731_v13 }
 0x360   :  { %v1973_v34 = vmul.f32 %v1941_v7, %v1532_v49 }
 0x361   :  { %v1972_v27 = vmul.f32 %v1940_v0, %v1530_v6 }
 0x362   :  { %v2066_v45 = vmul.f32 %v3729_v31, %v1973_v34  ;;  %v2733_v12 = vpop.eup %2732 }
 0x363   :  { %v2065_v24 = vmul.f32 %v3729_v31, %v1972_v27  ;;  %v2735_v34 = vpop.eup %2734 }
 0x364   :  { %v2144_v23 = vsel %vm120_vm0, %v2066_v45, 0.0 }
 0x365   :  { %2145 = vadd.xlane.f32.xlu0 %v2144_v23  ;;  %v2470_v63 = vpop.f32.mrb[104].mxu1  ;;  %v2141_v57 = vsel %vm120_vm0, %v2065_v24, 0.0  ;;  %v1548_v23 = vadd.f32 1.0, %v2733_v12 }
 0x366   :  { %v1885_v16 = vadd.f32 %v2470_v63, %v3723_v22  ;;  %2142 = vadd.xlane.f32.xlu1 %v2141_v57  ;;  %v1879_v4 = vpop.f32.mrb[105].mxu1  ;;  %v1546_v63 = vadd.f32 1.0, %v2735_v34 }
 0x367   :  { %v1880_v20 = vadd.f32 %v3723_v22, %v1879_v4 }
 0x368   :  { %v1943_v33 = vmax.f32 %v1885_v16, 0.0 }
 0x369   :  { %v1942_v2 = vmax.f32 %v1880_v20, 0.0 }
 0x36a   :  { %v1975_v3 = vmul.f32 %v1943_v33, %v1536_v26 }
 0x36b   :  { %v1974_v53 = vmul.f32 %v1942_v2, %v1534_v1 }
 0x36c   :  { %v2068_v15 = vmul.f32 %v3729_v31, %v1975_v3 }
 0x36d   :  { %v2473_v36 = vpop.f32.mrb[106].mxu1  ;;  %v2067_v9 = vmul.f32 %v3729_v31, %v1974_v53 }
 0x36e   :  { %v1895_v55 = vadd.f32 %v2473_v36, %v3723_v22  ;;  %v1889_v17 = vpop.f32.mrb[107].mxu1  ;;  %v2150_v62 = vsel %vm120_vm0, %v2068_v15, 0.0 }
 0x36f   :  { %v1890_v56 = vadd.f32 %v3723_v22, %v1889_v17  ;;  %2151 = vadd.xlane.f32.xlu0 %v2150_v62  ;;  %v2147_v19 = vsel %vm120_vm0, %v2067_v9, 0.0 }
 0x370   :  { %v1945_v8 = vmax.f32 %v1895_v55, 0.0  ;;  %2148 = vadd.xlane.f32.xlu1 %v2147_v19 }
 0x371   :  { %v1944_v41 = vmax.f32 %v1890_v56, 0.0 }
 0x372   :  { %v1977_v44 = vmul.f32 %v1945_v8, %v1540_v18 }
 0x373   :  { %v1976_v25 = vmul.f32 %v1944_v41, %v1538_v40 }
 0x374   :  { %v2070_v37 = vmul.f32 %v3729_v31, %v1977_v44 }
 0x375   :  { %v2476_v35 = vpop.f32.mrb[108].mxu1  ;;  %v2069_v61 = vmul.f32 %v3729_v31, %v1976_v25 }
 0x376   :  { %v1905_v48 = vadd.f32 %v2476_v35, %v3723_v22  ;;  %v1899_v28 = vpop.f32.mrb[109].mxu1  ;;  %v2156_v39 = vsel %vm120_vm0, %v2070_v37, 0.0 }
 0x377   :  { %v1900_v50 = vadd.f32 %v3723_v22, %v1899_v28  ;;  %2157 = vadd.xlane.f32.xlu0 %v2156_v39  ;;  %v2153_v43 = vsel %vm120_vm0, %v2069_v61, 0.0 }
 0x378   :  { %v1947_v46 = vmax.f32 %v1905_v48, 0.0  ;;  %2154 = vadd.xlane.f32.xlu1 %v2153_v43 }
 0x379   :  { %v1946_v21 = vmax.f32 %v1900_v50, 0.0 }
 0x37a   :  { %v1979_v49 = vmul.f32 %v1947_v46, %v1544_v60 }
 0x37b   :  { %v1978_v7 = vmul.f32 %v1946_v21, %v1542_v5 }
 0x37c   :  { %v2072_v6 = vmul.f32 %v3729_v31, %v1979_v49 }
 0x37d   :  { %v2479_v0 = vpop.f32.mrb[110].mxu1  ;;  %v2071_v59 = vmul.f32 %v3729_v31, %v1978_v7 }
 0x37e   :  { %v1915_v27 = vadd.f32 %v2479_v0, %v3723_v22  ;;  %v1909_v45 = vpop.f32.mrb[111].mxu1  ;;  %v2162_v47 = vsel %vm120_vm0, %v2072_v6, 0.0 }
 0x37f   :  { %v1910_v24 = vadd.f32 %v3723_v22, %v1909_v45  ;;  %2163 = vadd.xlane.f32.xlu0 %v2162_v47  ;;  %v2159_v52 = vsel %vm120_vm0, %v2071_v59, 0.0  ;;  %v3880_v22 = vld [vmem:[#allocation2] ss:$0 sm:$0xff] }
 0x380   :  { %v1949_v11 = vmax.f32 %v1915_v27, 0.0  ;;  %2160 = vadd.xlane.f32.xlu1 %v2159_v52 }
 0x381   :  { %v1948_v57 = vmax.f32 %v1910_v24, 0.0 }
 0x382   :  { %v1981_v58 = vmul.f32 %v1949_v11, %v1548_v23 }
 0x383   :  { %v1980_v16 = vmul.f32 %v1948_v57, %v1546_v63 }
 0x384   :  { %v2074_v4 = vmul.f32 %v3729_v31, %v1981_v58 }
 0x385   :  { %v2073_v54 = vmul.f32 %v3729_v31, %v1980_v16 }
 0x386   :  { %v2168_v20 = vsel %vm120_vm0, %v2074_v4, 0.0 }
 0x387   :  { %2169 = vadd.xlane.f32.xlu0 %v2168_v20  ;;  %v2165_v26 = vsel %vm120_vm0, %v2073_v54, 0.0 }
 0x388   :  { %2166 = vadd.xlane.f32.xlu1 %v2165_v26 }
 0x39a   :  { %v2080_v29 = vpop.xlane.xlu1 %2079 }
 0x39b   :  { %v2178_v33 = vadd.f32 %v3880_v22, %v2080_v29  ;;  %v2077_v1 = vpop.xlane.xlu0 %2076 }
 0x39c   :  { %v2177_v2 = vadd.f32 %v3880_v22, %v2077_v1 }
 0x39d   :  { %2211 = vst.msk [vmem:[%s4053_s11 + $0x8] sm:$0xff] %vm2209_vm6, %v2178_v33 }
 0x39e   :  { %2210 = vst.msk [vmem:[%s4053_s11] sm:$0xff] %vm2209_vm6, %v2177_v2 }
 0x3a2   :  { %v2086_v31 = vpop.xlane.xlu0 %2085 }
 0x3a3   :  { %v2180_v3 = vadd.f32 %v3880_v22, %v2086_v31 }
 0x3a5   :  { %2213 = vst.msk [vmem:[%s4053_s11 + $0x18] sm:$0xff] %vm2209_vm6, %v2180_v3 }
 0x3a6   :  { %v2083_v14 = vpop.xlane.xlu0 %2082 }
 0x3a7   :  { %v2179_v53 = vadd.f32 %v3880_v22, %v2083_v14 }
 0x3a9   :  { %2212 = vst.msk [vmem:[%s4053_s11 + $0x10] sm:$0xff] %vm2209_vm6, %v2179_v53 }
 0x3aa   :  { %v2092_v32 = vpop.xlane.xlu0 %2091 }
 0x3ab   :  { %v2182_v15 = vadd.f32 %v3880_v22, %v2092_v32  ;;  %v2089_v42 = vpop.xlane.xlu1 %2088 }
 0x3ac   :  { %v2181_v36 = vadd.f32 %v3880_v22, %v2089_v42 }
 0x3ad   :  { %2215 = vst.msk [vmem:[%s4053_s11 + $0x28] sm:$0xff] %vm2209_vm6, %v2182_v15 }
 0x3ae   :  { %2214 = vst.msk [vmem:[%s4053_s11 + $0x20] sm:$0xff] %vm2209_vm6, %v2181_v36 }
 0x3b2   :  { %v2098_v9 = vpop.xlane.xlu0 %2097 }
 0x3b3   :  { %v2184_v38 = vadd.f32 %v3880_v22, %v2098_v9  ;;  %v2095_v55 = vpop.xlane.xlu1 %2094 }
 0x3b4   :  { %v2183_v17 = vadd.f32 %v3880_v22, %v2095_v55 }
 0x3b5   :  { %2217 = vst.msk [vmem:[%s4053_s11 + $0x38] sm:$0xff] %vm2209_vm6, %v2184_v38 }
 0x3b6   :  { %2216 = vst.msk [vmem:[%s4053_s11 + $0x30] sm:$0xff] %vm2209_vm6, %v2183_v17 }
 0x3ba   :  { %v2104_v62 = vpop.xlane.xlu0 %2103 }
 0x3bb   :  { %v2186_v30 = vadd.f32 %v3880_v22, %v2104_v62  ;;  %v2101_v56 = vpop.xlane.xlu1 %2100 }
 0x3bc   :  { %v2185_v19 = vadd.f32 %v3880_v22, %v2101_v56 }
 0x3bd   :  { %2219 = vst.msk [vmem:[%s4053_s11 + $0x48] sm:$0xff] %vm2209_vm6, %v2186_v30 }
 0x3be   :  { %2218 = vst.msk [vmem:[%s4053_s11 + $0x40] sm:$0xff] %vm2209_vm6, %v2185_v19 }
 0x3c2   :  { %v2110_v18 = vpop.xlane.xlu0 %2109 }
 0x3c3   :  { %v2188_v51 = vadd.f32 %v3880_v22, %v2110_v18  ;;  %v2107_v8 = vpop.xlane.xlu1 %2106 }
 0x3c4   :  { %v2187_v40 = vadd.f32 %v3880_v22, %v2107_v8 }
 0x3c5   :  { %2221 = vst.msk [vmem:[%s4053_s11 + $0x58] sm:$0xff] %vm2209_vm6, %v2188_v51 }
 0x3c6   :  { %2220 = vst.msk [vmem:[%s4053_s11 + $0x50] sm:$0xff] %vm2209_vm6, %v2187_v40 }
 0x3ca   :  { %v2116_v41 = vpop.xlane.xlu0 %2115 }
 0x3cb   :  { %v2190_v44 = vadd.f32 %v3880_v22, %v2116_v41  ;;  %v2113_v25 = vpop.xlane.xlu1 %2112 }
 0x3cc   :  { %v2189_v37 = vadd.f32 %v3880_v22, %v2113_v25 }
 0x3cd   :  { %2223 = vst.msk [vmem:[%s4053_s11 + $0x68] sm:$0xff] %vm2209_vm6, %v2190_v44 }
 0x3ce   :  { %2222 = vst.msk [vmem:[%s4053_s11 + $0x60] sm:$0xff] %vm2209_vm6, %v2189_v37 }
 0x3d2   :  { %v2122_v10 = vpop.xlane.xlu0 %2121 }
 0x3d3   :  { %v2192_v35 = vadd.f32 %v3880_v22, %v2122_v10  ;;  %v2119_v61 = vpop.xlane.xlu1 %2118 }
 0x3d4   :  { %v2191_v13 = vadd.f32 %v3880_v22, %v2119_v61 }
 0x3d5   :  { %2225 = vst.msk [vmem:[%s4053_s11 + $0x78] sm:$0xff] %vm2209_vm6, %v2192_v35 }
 0x3d6   :  { %2224 = vst.msk [vmem:[%s4053_s11 + $0x70] sm:$0xff] %vm2209_vm6, %v2191_v13 }
 0x3da   :  { %v2128_v48 = vpop.xlane.xlu0 %2127 }
 0x3db   :  { %v2194_v28 = vadd.f32 %v3880_v22, %v2128_v48  ;;  %v2125_v39 = vpop.xlane.xlu1 %2124 }
 0x3dc   :  { %v2193_v50 = vadd.f32 %v3880_v22, %v2125_v39 }
 0x3dd   :  { %2227 = vst.msk [vmem:[%s4053_s11 + $0x88] sm:$0xff] %vm2209_vm6, %v2194_v28 }
 0x3de   :  { %2226 = vst.msk [vmem:[%s4053_s11 + $0x80] sm:$0xff] %vm2209_vm6, %v2193_v50 }
 0x3e2   :  { %v2134_v43 = vpop.xlane.xlu0 %2133 }
 0x3e3   :  { %v2196_v60 = vadd.f32 %v3880_v22, %v2134_v43  ;;  %v2131_v46 = vpop.xlane.xlu1 %2130 }
 0x3e4   :  { %v2195_v5 = vadd.f32 %v3880_v22, %v2131_v46 }
 0x3e5   :  { %2229 = vst.msk [vmem:[%s4053_s11 + $0x98] sm:$0xff] %vm2209_vm6, %v2196_v60 }
 0x3e6   :  { %2228 = vst.msk [vmem:[%s4053_s11 + $0x90] sm:$0xff] %vm2209_vm6, %v2195_v5 }
 0x3ea   :  { %v2140_v21 = vpop.xlane.xlu0 %2139 }
 0x3eb   :  { %v2198_v49 = vadd.f32 %v3880_v22, %v2140_v21  ;;  %v2137_v7 = vpop.xlane.xlu1 %2136 }
 0x3ec   :  { %v2197_v6 = vadd.f32 %v3880_v22, %v2137_v7 }
 0x3ed   :  { %2231 = vst.msk [vmem:[%s4053_s11 + $0xa8] sm:$0xff] %vm2209_vm6, %v2198_v49 }
 0x3ee   :  { %2230 = vst.msk [vmem:[%s4053_s11 + $0xa0] sm:$0xff] %vm2209_vm6, %v2197_v6 }
 0x3f2   :  { %v2146_v12 = vpop.xlane.xlu0 %2145 }
 0x3f3   :  { %v2200_v0 = vadd.f32 %v3880_v22, %v2146_v12  ;;  %v2143_v59 = vpop.xlane.xlu1 %2142 }
 0x3f4   :  { %v2199_v34 = vadd.f32 %v3880_v22, %v2143_v59 }
 0x3f5   :  { %2233 = vst.msk [vmem:[%s4053_s11 + $0xb8] sm:$0xff] %vm2209_vm6, %v2200_v0 }
 0x3f6   :  { %2232 = vst.msk [vmem:[%s4053_s11 + $0xb0] sm:$0xff] %vm2209_vm6, %v2199_v34 }
 0x3fc   :  { %v2152_v27 = vpop.xlane.xlu0 %2151 }
 0x3fd   :  { %v2202_v45 = vadd.f32 %v3880_v22, %v2152_v27  ;;  %v2149_v47 = vpop.xlane.xlu1 %2148 }
 0x3fe   :  { %v2201_v24 = vadd.f32 %v3880_v22, %v2149_v47 }
 0x3ff   :  { %2235 = vst.msk [vmem:[%s4053_s11 + $0xc8] sm:$0xff] %vm2209_vm6, %v2202_v45 }
 0x400   :  { %2234 = vst.msk [vmem:[%s4053_s11 + $0xc0] sm:$0xff] %vm2209_vm6, %v2201_v24 }
 0x404   :  { %v2158_v52 = vpop.xlane.xlu0 %2157 }
 0x405   :  { %v2204_v23 = vadd.f32 %v3880_v22, %v2158_v52  ;;  %v2155_v11 = vpop.xlane.xlu1 %2154 }
 0x406   :  { %v2203_v63 = vadd.f32 %v3880_v22, %v2155_v11 }
 0x407   :  { %2237 = vst.msk [vmem:[%s4053_s11 + $0xd8] sm:$0xff] %vm2209_vm6, %v2204_v23 }
 0x408   :  { %2236 = vst.msk [vmem:[%s4053_s11 + $0xd0] sm:$0xff] %vm2209_vm6, %v2203_v63 }
 0x40c   :  { %v2164_v57 = vpop.xlane.xlu0 %2163 }
 0x40d   :  { %v2206_v58 = vadd.f32 %v3880_v22, %v2164_v57  ;;  %v2161_v16 = vpop.xlane.xlu1 %2160 }
 0x40e   :  { %v2205_v4 = vadd.f32 %v3880_v22, %v2161_v16 }
 0x40f   :  { %2239 = vst.msk [vmem:[%s4053_s11 + $0xe8] sm:$0xff] %vm2209_vm6, %v2206_v58 }
 0x410   :  { %2238 = vst.msk [vmem:[%s4053_s11 + $0xe0] sm:$0xff] %vm2209_vm6, %v2205_v4 }
 0x414   :  { %v2170_v54 = vpop.xlane.xlu0 %2169 }
 0x415   :  { %v2208_v20 = vadd.f32 %v3880_v22, %v2170_v54  ;;  %v2167_v26 = vpop.xlane.xlu1 %2166 }
 0x416   :  { %v2207_v29 = vadd.f32 %v3880_v22, %v2167_v26 }
 0x417   :  { %2241 = vst.msk [vmem:[%s4053_s11 + $0xf8] sm:$0xff] %vm2209_vm6, %v2208_v20 }
 0x418   :  { %2240 = vst.msk [vmem:[%s4053_s11 + $0xf0] sm:$0xff] %vm2209_vm6, %v2207_v29 }

</bundles_post_ra>
